<compile_context>
chip_gen: v6e
topology: v6e:2x2x1
jax: 0.10.0
libtpu: 0.0.40
codegen_flags: <defaults>
</compile_context>

<pallas_src>
import jax
import jax.numpy as jnp
from jax.experimental import pallas as pl
from jax.experimental.pallas import tpu as pltpu

INPUT = 700
HIDDEN = 128
OUT = 20

# bf16 MXU inputs only when actually running on TPU hardware; plain f32
# otherwise (CPU / interpret harness does not support bf16xbf16=f32 dots).
_ON_TPU = jax.default_backend() == "tpu"
_MXU_DTYPE = jnp.bfloat16 if _ON_TPU else jnp.float32


def gru_recurrent_kernel(gi_ref, whh_ref, bhn_ref, hs_ref, h_ref):
    """One grid step == TT timesteps of the GRU recurrence.

    gi_ref : (TT, B, 3H)  precomputed x@W_ih^T + b_ih (+ b_hr/b_hz folded in)
    whh_ref: (H, 3H)      W_hh^T (MXU dtype)
    bhn_ref: (1, H)       b_hn (f32) — must stay inside the r*(.) term
    hs_ref : (TT, B, H)   output hidden states (lane-dense, 128 lanes)
    h_ref  : (B, H)       VMEM scratch carrying h across grid steps (f32)
    """
    H = HIDDEN

    # h0 = 0 (PyTorch default when no initial hidden state is given)
    @pl.when(pl.program_id(0) == 0)
    def _():
        h_ref[...] = jnp.zeros_like(h_ref)

    # Hoist constant loads out of the inner timestep loop.
    whh = whh_ref[...]          # (H, 3H) MXU dtype
    bhn = bhn_ref[...]          # (1, H)  f32
    TT = gi_ref.shape[0]

    def step(tt, h_prev):
        g = gi_ref[tt].astype(jnp.float32)                         # (B, 3H)
        gh = jnp.dot(h_prev.astype(whh.dtype), whh,
                     preferred_element_type=jnp.float32)           # (B, 3H)
        # PyTorch gate order along the 3*H axis is [r, z, n]
        r = jax.nn.sigmoid(g[:, 0:H] + gh[:, 0:H])
        z = jax.nn.sigmoid(g[:, H:2 * H] + gh[:, H:2 * H])
        n = jnp.tanh(g[:, 2 * H:3 * H] + r * (gh[:, 2 * H:3 * H] + bhn))
        h_new = (1.0 - z) * n + z * h_prev                         # f32
        hs_ref[tt] = h_new.astype(hs_ref.dtype)                    # lane-dense store
        return h_new

    # Partial unroll: keeps LLO scheduling visibility without blowing up the
    # instruction stream / vreg pressure at larger TT.
    h_last = jax.lax.fori_loop(0, TT, step, h_ref[...], unroll=min(8, TT))
    h_ref[...] = h_last


def p_ann_gru_forward(x_input, params, tt_block=32):
    """x_input: (B, T, 700) float32  ->  (T, B, 20) float32 (matches PyTorch)."""
    B, T, F = x_input.shape
    assert F == INPUT
    H = HIDDEN

    wih_t = params["weight_ih"].T                         # (700, 384) f32
    whh_t = params["weight_hh"].T.astype(_MXU_DTYPE)      # (128, 384)
    bih = params["bias_ih"]                               # (384,)
    bhh = params["bias_hh"]                               # (384,)
    wfc_t = params["fc_weight"].T.astype(_MXU_DTYPE)      # (128, 20)
    bfc = params["fc_bias"]                               # (20,)

    # Fold b_hr / b_hz into the precomputed gi (they are outside the r*(.)
    # term, so this is exact).  b_hn stays inside the kernel.
    bias_fused = bih + jnp.concatenate([bhh[:2 * H], jnp.zeros((H,), bhh.dtype)])
    bhn = bhh[2 * H:].reshape(1, H).astype(jnp.float32)   # (1, 128)

    # --- Hoisted input projection (all timesteps, no recurrence dependence).
    # f32 accumulation for parity with PyTorch; stored gi cast to MXU dtype to
    # halve the per-step DMA into the recurrent kernel.
    gi = jnp.einsum("btf,fg->tbg", x_input, wih_t,
                    preferred_element_type=jnp.float32) + bias_fused
    gi = gi.astype(_MXU_DTYPE)                            # (T, B, 384)

    # --- Block TT timesteps per grid step (pad T if needed). ---
    TT = max(1, min(tt_block, T))
    T_pad = -(-T // TT) * TT
    if T_pad != T:
        gi = jnp.pad(gi, ((0, T_pad - T), (0, 0), (0, 0)))

    # VMEM: gi block is TT*B*384*bytes double-buffered + hs block — tiny at
    # SHD-scale B, well under the v7x 64 MiB physical / 32 MiB scoped limit.
    grid_spec = pltpu.PrefetchScalarGridSpec(
        num_scalar_prefetch=0,
        grid=(T_pad // TT,),
        in_specs=[
            pl.BlockSpec((TT, B, 3 * H), lambda t: (t, 0, 0)),   # gi block
            pl.BlockSpec((H, 3 * H), lambda t: (0, 0)),          # W_hh^T
            pl.BlockSpec((1, H), lambda t: (0, 0)),              # b_hn
        ],
        out_specs=pl.BlockSpec((TT, B, H), lambda t: (t, 0, 0)),  # h states
        scratch_shapes=[pltpu.VMEM((B, H), jnp.float32)],         # carried h
    )

    hs = pl.pallas_call(
        gru_recurrent_kernel,
        out_shape=jax.ShapeDtypeStruct((T_pad, B, H), _MXU_DTYPE),
        grid_spec=grid_spec,
        compiler_params=pltpu.CompilerParams(
            dimension_semantics=("arbitrary",)),   # recurrence: sequential in T
    )(gi, whh_t, bhn)

    # Padded timesteps update the carried h with zero-input garbage, but those
    # rows are sliced off and h_T is never returned, so the output is exact.
    hs = hs[:T]                                            # (T, B, 128)

    # --- Hoisted per-step FC as one batched matmul: (T, B, 128) -> (T, B, 20).
    return jnp.einsum("tbh,ho->tbo", hs, wfc_t,
                      preferred_element_type=jnp.float32) + bfc


def p_ann_gru_reference(x_input, params):
    """Pure-JAX f32 reference mirroring torch.nn.GRU + Linear."""
    x_tm = jnp.transpose(x_input, (1, 0, 2))  # (T, B, 700)
    B = x_tm.shape[1]
    wih, whh = params["weight_ih"], params["weight_hh"]
    bih, bhh = params["bias_ih"], params["bias_hh"]
    H = HIDDEN

    def step(h, x_t):
        gi = x_t @ wih.T + bih
        gh = h @ whh.T + bhh
        r = jax.nn.sigmoid(gi[:, 0:H] + gh[:, 0:H])
        z = jax.nn.sigmoid(gi[:, H:2 * H] + gh[:, H:2 * H])
        n = jnp.tanh(gi[:, 2 * H:3 * H] + r * gh[:, 2 * H:3 * H])
        h_new = (1.0 - z) * n + z * h
        return h_new, h_new

    h0 = jnp.zeros((B, H), jnp.float32)
    _, hs = jax.lax.scan(step, h0, x_tm)                     # (T, B, 128)
    return hs @ params["fc_weight"].T + params["fc_bias"]    # (T, B, 20)


def init_params(key):
    """Deterministic init matching PyTorch default shapes (uniform +-1/sqrt(H))."""
    k = 1.0 / jnp.sqrt(jnp.float32(HIDDEN))
    keys = jax.random.split(key, 6)
    u = lambda kk, shape: jax.random.uniform(kk, shape, jnp.float32, -k, k)
    return {
        "weight_ih": u(keys[0], (3 * HIDDEN, INPUT)),   # (384, 700)
        "weight_hh": u(keys[1], (3 * HIDDEN, HIDDEN)),  # (384, 128)
        "bias_ih":   u(keys[2], (3 * HIDDEN,)),         # (384,)
        "bias_hh":   u(keys[3], (3 * HIDDEN,)),         # (384,)
        "fc_weight": u(keys[4], (OUT, HIDDEN)),         # (20, 128)
        "fc_bias":   u(keys[5], (OUT,)),                # (20,)
    }


if __name__ == "__main__":
    key = jax.random.PRNGKey(0)
    k_par, k_x = jax.random.split(key)

    params = init_params(k_par)

    B, T = 2, 8
    x_input = jax.random.normal(k_x, (B, T, INPUT), jnp.float32)  # PyTorch (N, T, 700)

    out = p_ann_gru_forward(x_input, params)
    out = jax.block_until_ready(out)

    ref = p_ann_gru_reference(x_input, params)
    max_err = float(jnp.max(jnp.abs(out - ref)))
    assert out.shape == (T, B, OUT), out.shape
    assert max_err < 2e-2, f"mismatch vs reference: {max_err}"

    print("KERNEL_OK")
</pallas_src>

<mosaic_0001>
module attributes {stable_mosaic.version = 11 : i64} {
  func.func @gru_recurrent_kernel(%arg0: i32, %arg1: memref<8x2x384xf32, #tpu.memory_space<vmem>>, %arg2: memref<128x384xf32, #tpu.memory_space<vmem>>, %arg3: memref<1x128xf32, #tpu.memory_space<vmem>>, %arg4: memref<8x2x128xf32, #tpu.memory_space<vmem>>, %arg5: memref<2x128xf32, #tpu.memory_space<vmem>>) attributes {dimension_semantics = [#tpu.dimension_semantics<arbitrary>], iteration_bounds = array<i64: 1>, scalar_prefetch = 0 : i64, scratch_operands = 1 : i64, tpu.core_type = #tpu.core_type<tc>, window_params = [{transform_indices = @transform_0, window_bounds = array<i64: 8, 2, 384>}, {pipeline_mode = #tpu.pipeline_mode<synchronous>, transform_indices = @transform_1, window_bounds = array<i64: 128, 384>}, {pipeline_mode = #tpu.pipeline_mode<synchronous>, transform_indices = @transform_2, window_bounds = array<i64: 1, 128>}, {transform_indices = @transform_3, window_bounds = array<i64: 8, 2, 128>}]} {
    %c0_i32 = arith.constant 0 : i32
    %0 = arith.cmpi eq, %arg0, %c0_i32 : i32
    %1 = arith.extui %0 : i1 to i32
    %c0_i32_0 = arith.constant 0 : i32
    %2 = arith.cmpi ne, %1, %c0_i32_0 : i32
    scf.if %2 {
      %cst_72 = arith.constant 0.000000e+00 : f32
      %295 = vector.broadcast %cst_72 : f32 to vector<2x128xf32>
      %c0_73 = arith.constant 0 : index
      %c0_74 = arith.constant 0 : index
      %296 = vector.load %arg5[%c0_73, %c0_74] : memref<2x128xf32, #tpu.memory_space<vmem>>, vector<2x128xf32>
      tpu.vector_store %arg5[%c0_73, %c0_74], %295 {strides = array<i32>} : memref<2x128xf32, #tpu.memory_space<vmem>>, vector<2x128xf32>,
    } else {
    }
    %c0 = arith.constant 0 : index
    %c0_1 = arith.constant 0 : index
    %3 = vector.load %arg2[%c0, %c0_1] : memref<128x384xf32, #tpu.memory_space<vmem>>, vector<128x384xf32>
    %c0_2 = arith.constant 0 : index
    %c0_3 = arith.constant 0 : index
    %4 = vector.load %arg3[%c0_2, %c0_3] : memref<1x128xf32, #tpu.memory_space<vmem>>, vector<1x128xf32>
    %c0_4 = arith.constant 0 : index
    %c0_5 = arith.constant 0 : index
    %5 = vector.load %arg5[%c0_4, %c0_5] : memref<2x128xf32, #tpu.memory_space<vmem>>, vector<2x128xf32>
    %c0_i32_6 = arith.constant 0 : i32
    %6 = arith.index_cast %c0_i32_6 : i32 to index
    %c0_7 = arith.constant 0 : index
    %c0_8 = arith.constant 0 : index
    %7 = vector.load %arg1[%6, %c0_7, %c0_8] : memref<8x2x384xf32, #tpu.memory_space<vmem>>, vector<1x2x384xf32>
    %8 = vector.shape_cast %7 : vector<1x2x384xf32> to vector<2x384xf32>
    %cst = arith.constant dense<0.000000e+00> : vector<2x384xf32>
    %9 = tpu.matmul %5, %3, %cst {dimension_numbers = #tpu.dot_dimension_numbers<[1], [0], [0], [1], [0, 0, 1, 1], [], []>} : vector<2x128xf32>, vector<128x384xf32>, vector<2x384xf32> -> vector<2x384xf32>
    %10 = vector.extract_strided_slice %8 {offsets = [0, 0], sizes = [2, 128], strides = [1, 1]} : vector<2x384xf32> to vector<2x128xf32>
    %11 = vector.extract_strided_slice %9 {offsets = [0, 0], sizes = [2, 128], strides = [1, 1]} : vector<2x384xf32> to vector<2x128xf32>
    %12 = arith.addf %10, %11 : vector<2x128xf32>
    %13 = arith.negf %12 : vector<2x128xf32>
    %14 = math.exp %13 : vector<2x128xf32>
    %cst_9 = arith.constant 1.000000e+00 : f32
    %15 = vector.broadcast %cst_9 : f32 to vector<2x128xf32>
    %16 = arith.addf %15, %14 : vector<2x128xf32>
    %17 = arith.divf %15, %16 : vector<2x128xf32>
    %18 = vector.extract_strided_slice %8 {offsets = [0, 128], sizes = [2, 128], strides = [1, 1]} : vector<2x384xf32> to vector<2x128xf32>
    %19 = vector.extract_strided_slice %9 {offsets = [0, 128], sizes = [2, 128], strides = [1, 1]} : vector<2x384xf32> to vector<2x128xf32>
    %20 = arith.addf %18, %19 : vector<2x128xf32>
    %21 = arith.negf %20 : vector<2x128xf32>
    %22 = math.exp %21 : vector<2x128xf32>
    %cst_10 = arith.constant 1.000000e+00 : f32
    %23 = vector.broadcast %cst_10 : f32 to vector<2x128xf32>
    %24 = arith.addf %23, %22 : vector<2x128xf32>
    %25 = arith.divf %23, %24 : vector<2x128xf32>
    %26 = vector.extract_strided_slice %8 {offsets = [0, 256], sizes = [2, 128], strides = [1, 1]} : vector<2x384xf32> to vector<2x128xf32>
    %27 = vector.extract_strided_slice %9 {offsets = [0, 256], sizes = [2, 128], strides = [1, 1]} : vector<2x384xf32> to vector<2x128xf32>
    %28 = vector.broadcast %4 : vector<1x128xf32> to vector<2x128xf32>
    %29 = arith.addf %27, %28 : vector<2x128xf32>
    %30 = arith.mulf %17, %29 : vector<2x128xf32>
    %31 = arith.addf %26, %30 : vector<2x128xf32>
    %32 = math.tanh %31 : vector<2x128xf32>
    %cst_11 = arith.constant 1.000000e+00 : f32
    %33 = vector.broadcast %cst_11 : f32 to vector<2x128xf32>
    %34 = arith.subf %33, %25 : vector<2x128xf32>
    %35 = arith.mulf %34, %32 : vector<2x128xf32>
    %36 = arith.mulf %25, %5 : vector<2x128xf32>
    %37 = arith.addf %35, %36 : vector<2x128xf32>
    %38 = arith.index_cast %c0_i32_6 : i32 to index
    %c0_12 = arith.constant 0 : index
    %c0_13 = arith.constant 0 : index
    %39 = vector.load %arg4[%38, %c0_12, %c0_13] : memref<8x2x128xf32, #tpu.memory_space<vmem>>, vector<1x2x128xf32>
    %40 = vector.shape_cast %39 : vector<1x2x128xf32> to vector<2x128xf32>
    %41 = vector.shape_cast %37 : vector<2x128xf32> to vector<1x2x128xf32>
    tpu.vector_store %arg4[%38, %c0_12, %c0_13], %41 {strides = array<i32>} : memref<8x2x128xf32, #tpu.memory_space<vmem>>, vector<1x2x128xf32>,
    %c1_i32 = arith.constant 1 : i32
    %42 = arith.index_cast %c1_i32 : i32 to index
    %c0_14 = arith.constant 0 : index
    %c0_15 = arith.constant 0 : index
    %43 = vector.load %arg1[%42, %c0_14, %c0_15] : memref<8x2x384xf32, #tpu.memory_space<vmem>>, vector<1x2x384xf32>
    %44 = vector.shape_cast %43 : vector<1x2x384xf32> to vector<2x384xf32>
    %cst_16 = arith.constant dense<0.000000e+00> : vector<2x384xf32>
    %45 = tpu.matmul %37, %3, %cst_16 {dimension_numbers = #tpu.dot_dimension_numbers<[1], [0], [0], [1], [0, 0, 1, 1], [], []>} : vector<2x128xf32>, vector<128x384xf32>, vector<2x384xf32> -> vector<2x384xf32>
    %46 = vector.extract_strided_slice %44 {offsets = [0, 0], sizes = [2, 128], strides = [1, 1]} : vector<2x384xf32> to vector<2x128xf32>
    %47 = vector.extract_strided_slice %45 {offsets = [0, 0], sizes = [2, 128], strides = [1, 1]} : vector<2x384xf32> to vector<2x128xf32>
    %48 = arith.addf %46, %47 : vector<2x128xf32>
    %49 = arith.negf %48 : vector<2x128xf32>
    %50 = math.exp %49 : vector<2x128xf32>
    %cst_17 = arith.constant 1.000000e+00 : f32
    %51 = vector.broadcast %cst_17 : f32 to vector<2x128xf32>
    %52 = arith.addf %51, %50 : vector<2x128xf32>
    %53 = arith.divf %51, %52 : vector<2x128xf32>
    %54 = vector.extract_strided_slice %44 {offsets = [0, 128], sizes = [2, 128], strides = [1, 1]} : vector<2x384xf32> to vector<2x128xf32>
    %55 = vector.extract_strided_slice %45 {offsets = [0, 128], sizes = [2, 128], strides = [1, 1]} : vector<2x384xf32> to vector<2x128xf32>
    %56 = arith.addf %54, %55 : vector<2x128xf32>
    %57 = arith.negf %56 : vector<2x128xf32>
    %58 = math.exp %57 : vector<2x128xf32>
    %cst_18 = arith.constant 1.000000e+00 : f32
    %59 = vector.broadcast %cst_18 : f32 to vector<2x128xf32>
    %60 = arith.addf %59, %58 : vector<2x128xf32>
    %61 = arith.divf %59, %60 : vector<2x128xf32>
    %62 = vector.extract_strided_slice %44 {offsets = [0, 256], sizes = [2, 128], strides = [1, 1]} : vector<2x384xf32> to vector<2x128xf32>
    %63 = vector.extract_strided_slice %45 {offsets = [0, 256], sizes = [2, 128], strides = [1, 1]} : vector<2x384xf32> to vector<2x128xf32>
    %64 = vector.broadcast %4 : vector<1x128xf32> to vector<2x128xf32>
    %65 = arith.addf %63, %64 : vector<2x128xf32>
    %66 = arith.mulf %53, %65 : vector<2x128xf32>
    %67 = arith.addf %62, %66 : vector<2x128xf32>
    %68 = math.tanh %67 : vector<2x128xf32>
    %cst_19 = arith.constant 1.000000e+00 : f32
    %69 = vector.broadcast %cst_19 : f32 to vector<2x128xf32>
    %70 = arith.subf %69, %61 : vector<2x128xf32>
    %71 = arith.mulf %70, %68 : vector<2x128xf32>
    %72 = arith.mulf %61, %37 : vector<2x128xf32>
    %73 = arith.addf %71, %72 : vector<2x128xf32>
    %74 = arith.index_cast %c1_i32 : i32 to index
    %c0_20 = arith.constant 0 : index
    %c0_21 = arith.constant 0 : index
    %75 = vector.load %arg4[%74, %c0_20, %c0_21] : memref<8x2x128xf32, #tpu.memory_space<vmem>>, vector<1x2x128xf32>
    %76 = vector.shape_cast %75 : vector<1x2x128xf32> to vector<2x128xf32>
    %77 = vector.shape_cast %73 : vector<2x128xf32> to vector<1x2x128xf32>
    tpu.vector_store %arg4[%74, %c0_20, %c0_21], %77 {strides = array<i32>} : memref<8x2x128xf32, #tpu.memory_space<vmem>>, vector<1x2x128xf32>,
    %c2_i32 = arith.constant 2 : i32
    %78 = arith.index_cast %c2_i32 : i32 to index
    %c0_22 = arith.constant 0 : index
    %c0_23 = arith.constant 0 : index
    %79 = vector.load %arg1[%78, %c0_22, %c0_23] : memref<8x2x384xf32, #tpu.memory_space<vmem>>, vector<1x2x384xf32>
    %80 = vector.shape_cast %79 : vector<1x2x384xf32> to vector<2x384xf32>
    %cst_24 = arith.constant dense<0.000000e+00> : vector<2x384xf32>
    %81 = tpu.matmul %73, %3, %cst_24 {dimension_numbers = #tpu.dot_dimension_numbers<[1], [0], [0], [1], [0, 0, 1, 1], [], []>} : vector<2x128xf32>, vector<128x384xf32>, vector<2x384xf32> -> vector<2x384xf32>
    %82 = vector.extract_strided_slice %80 {offsets = [0, 0], sizes = [2, 128], strides = [1, 1]} : vector<2x384xf32> to vector<2x128xf32>
    %83 = vector.extract_strided_slice %81 {offsets = [0, 0], sizes = [2, 128], strides = [1, 1]} : vector<2x384xf32> to vector<2x128xf32>
    %84 = arith.addf %82, %83 : vector<2x128xf32>
    %85 = arith.negf %84 : vector<2x128xf32>
    %86 = math.exp %85 : vector<2x128xf32>
    %cst_25 = arith.constant 1.000000e+00 : f32
    %87 = vector.broadcast %cst_25 : f32 to vector<2x128xf32>
    %88 = arith.addf %87, %86 : vector<2x128xf32>
    %89 = arith.divf %87, %88 : vector<2x128xf32>
    %90 = vector.extract_strided_slice %80 {offsets = [0, 128], sizes = [2, 128], strides = [1, 1]} : vector<2x384xf32> to vector<2x128xf32>
    %91 = vector.extract_strided_slice %81 {offsets = [0, 128], sizes = [2, 128], strides = [1, 1]} : vector<2x384xf32> to vector<2x128xf32>
    %92 = arith.addf %90, %91 : vector<2x128xf32>
    %93 = arith.negf %92 : vector<2x128xf32>
    %94 = math.exp %93 : vector<2x128xf32>
    %cst_26 = arith.constant 1.000000e+00 : f32
    %95 = vector.broadcast %cst_26 : f32 to vector<2x128xf32>
    %96 = arith.addf %95, %94 : vector<2x128xf32>
    %97 = arith.divf %95, %96 : vector<2x128xf32>
    %98 = vector.extract_strided_slice %80 {offsets = [0, 256], sizes = [2, 128], strides = [1, 1]} : vector<2x384xf32> to vector<2x128xf32>
    %99 = vector.extract_strided_slice %81 {offsets = [0, 256], sizes = [2, 128], strides = [1, 1]} : vector<2x384xf32> to vector<2x128xf32>
    %100 = vector.broadcast %4 : vector<1x128xf32> to vector<2x128xf32>
    %101 = arith.addf %99, %100 : vector<2x128xf32>
    %102 = arith.mulf %89, %101 : vector<2x128xf32>
    %103 = arith.addf %98, %102 : vector<2x128xf32>
    %104 = math.tanh %103 : vector<2x128xf32>
    %cst_27 = arith.constant 1.000000e+00 : f32
    %105 = vector.broadcast %cst_27 : f32 to vector<2x128xf32>
    %106 = arith.subf %105, %97 : vector<2x128xf32>
    %107 = arith.mulf %106, %104 : vector<2x128xf32>
    %108 = arith.mulf %97, %73 : vector<2x128xf32>
    %109 = arith.addf %107, %108 : vector<2x128xf32>
    %110 = arith.index_cast %c2_i32 : i32 to index
    %c0_28 = arith.constant 0 : index
    %c0_29 = arith.constant 0 : index
    %111 = vector.load %arg4[%110, %c0_28, %c0_29] : memref<8x2x128xf32, #tpu.memory_space<vmem>>, vector<1x2x128xf32>
    %112 = vector.shape_cast %111 : vector<1x2x128xf32> to vector<2x128xf32>
    %113 = vector.shape_cast %109 : vector<2x128xf32> to vector<1x2x128xf32>
    tpu.vector_store %arg4[%110, %c0_28, %c0_29], %113 {strides = array<i32>} : memref<8x2x128xf32, #tpu.memory_space<vmem>>, vector<1x2x128xf32>,
    %c3_i32 = arith.constant 3 : i32
    %114 = arith.index_cast %c3_i32 : i32 to index
    %c0_30 = arith.constant 0 : index
    %c0_31 = arith.constant 0 : index
    %115 = vector.load %arg1[%114, %c0_30, %c0_31] : memref<8x2x384xf32, #tpu.memory_space<vmem>>, vector<1x2x384xf32>
    %116 = vector.shape_cast %115 : vector<1x2x384xf32> to vector<2x384xf32>
    %cst_32 = arith.constant dense<0.000000e+00> : vector<2x384xf32>
    %117 = tpu.matmul %109, %3, %cst_32 {dimension_numbers = #tpu.dot_dimension_numbers<[1], [0], [0], [1], [0, 0, 1, 1], [], []>} : vector<2x128xf32>, vector<128x384xf32>, vector<2x384xf32> -> vector<2x384xf32>
    %118 = vector.extract_strided_slice %116 {offsets = [0, 0], sizes = [2, 128], strides = [1, 1]} : vector<2x384xf32> to vector<2x128xf32>
    %119 = vector.extract_strided_slice %117 {offsets = [0, 0], sizes = [2, 128], strides = [1, 1]} : vector<2x384xf32> to vector<2x128xf32>
    %120 = arith.addf %118, %119 : vector<2x128xf32>
    %121 = arith.negf %120 : vector<2x128xf32>
    %122 = math.exp %121 : vector<2x128xf32>
    %cst_33 = arith.constant 1.000000e+00 : f32
    %123 = vector.broadcast %cst_33 : f32 to vector<2x128xf32>
    %124 = arith.addf %123, %122 : vector<2x128xf32>
    %125 = arith.divf %123, %124 : vector<2x128xf32>
    %126 = vector.extract_strided_slice %116 {offsets = [0, 128], sizes = [2, 128], strides = [1, 1]} : vector<2x384xf32> to vector<2x128xf32>
    %127 = vector.extract_strided_slice %117 {offsets = [0, 128], sizes = [2, 128], strides = [1, 1]} : vector<2x384xf32> to vector<2x128xf32>
    %128 = arith.addf %126, %127 : vector<2x128xf32>
    %129 = arith.negf %128 : vector<2x128xf32>
    %130 = math.exp %129 : vector<2x128xf32>
    %cst_34 = arith.constant 1.000000e+00 : f32
    %131 = vector.broadcast %cst_34 : f32 to vector<2x128xf32>
    %132 = arith.addf %131, %130 : vector<2x128xf32>
    %133 = arith.divf %131, %132 : vector<2x128xf32>
    %134 = vector.extract_strided_slice %116 {offsets = [0, 256], sizes = [2, 128], strides = [1, 1]} : vector<2x384xf32> to vector<2x128xf32>
    %135 = vector.extract_strided_slice %117 {offsets = [0, 256], sizes = [2, 128], strides = [1, 1]} : vector<2x384xf32> to vector<2x128xf32>
    %136 = vector.broadcast %4 : vector<1x128xf32> to vector<2x128xf32>
    %137 = arith.addf %135, %136 : vector<2x128xf32>
    %138 = arith.mulf %125, %137 : vector<2x128xf32>
    %139 = arith.addf %134, %138 : vector<2x128xf32>
    %140 = math.tanh %139 : vector<2x128xf32>
    %cst_35 = arith.constant 1.000000e+00 : f32
    %141 = vector.broadcast %cst_35 : f32 to vector<2x128xf32>
    %142 = arith.subf %141, %133 : vector<2x128xf32>
    %143 = arith.mulf %142, %140 : vector<2x128xf32>
    %144 = arith.mulf %133, %109 : vector<2x128xf32>
    %145 = arith.addf %143, %144 : vector<2x128xf32>
    %146 = arith.index_cast %c3_i32 : i32 to index
    %c0_36 = arith.constant 0 : index
    %c0_37 = arith.constant 0 : index
    %147 = vector.load %arg4[%146, %c0_36, %c0_37] : memref<8x2x128xf32, #tpu.memory_space<vmem>>, vector<1x2x128xf32>
    %148 = vector.shape_cast %147 : vector<1x2x128xf32> to vector<2x128xf32>
    %149 = vector.shape_cast %145 : vector<2x128xf32> to vector<1x2x128xf32>
    tpu.vector_store %arg4[%146, %c0_36, %c0_37], %149 {strides = array<i32>} : memref<8x2x128xf32, #tpu.memory_space<vmem>>, vector<1x2x128xf32>,
    %c4_i32 = arith.constant 4 : i32
    %150 = arith.index_cast %c4_i32 : i32 to index
    %c0_38 = arith.constant 0 : index
    %c0_39 = arith.constant 0 : index
    %151 = vector.load %arg1[%150, %c0_38, %c0_39] : memref<8x2x384xf32, #tpu.memory_space<vmem>>, vector<1x2x384xf32>
    %152 = vector.shape_cast %151 : vector<1x2x384xf32> to vector<2x384xf32>
    %cst_40 = arith.constant dense<0.000000e+00> : vector<2x384xf32>
    %153 = tpu.matmul %145, %3, %cst_40 {dimension_numbers = #tpu.dot_dimension_numbers<[1], [0], [0], [1], [0, 0, 1, 1], [], []>} : vector<2x128xf32>, vector<128x384xf32>, vector<2x384xf32> -> vector<2x384xf32>
    %154 = vector.extract_strided_slice %152 {offsets = [0, 0], sizes = [2, 128], strides = [1, 1]} : vector<2x384xf32> to vector<2x128xf32>
    %155 = vector.extract_strided_slice %153 {offsets = [0, 0], sizes = [2, 128], strides = [1, 1]} : vector<2x384xf32> to vector<2x128xf32>
    %156 = arith.addf %154, %155 : vector<2x128xf32>
    %157 = arith.negf %156 : vector<2x128xf32>
    %158 = math.exp %157 : vector<2x128xf32>
    %cst_41 = arith.constant 1.000000e+00 : f32
    %159 = vector.broadcast %cst_41 : f32 to vector<2x128xf32>
    %160 = arith.addf %159, %158 : vector<2x128xf32>
    %161 = arith.divf %159, %160 : vector<2x128xf32>
    %162 = vector.extract_strided_slice %152 {offsets = [0, 128], sizes = [2, 128], strides = [1, 1]} : vector<2x384xf32> to vector<2x128xf32>
    %163 = vector.extract_strided_slice %153 {offsets = [0, 128], sizes = [2, 128], strides = [1, 1]} : vector<2x384xf32> to vector<2x128xf32>
    %164 = arith.addf %162, %163 : vector<2x128xf32>
    %165 = arith.negf %164 : vector<2x128xf32>
    %166 = math.exp %165 : vector<2x128xf32>
    %cst_42 = arith.constant 1.000000e+00 : f32
    %167 = vector.broadcast %cst_42 : f32 to vector<2x128xf32>
    %168 = arith.addf %167, %166 : vector<2x128xf32>
    %169 = arith.divf %167, %168 : vector<2x128xf32>
    %170 = vector.extract_strided_slice %152 {offsets = [0, 256], sizes = [2, 128], strides = [1, 1]} : vector<2x384xf32> to vector<2x128xf32>
    %171 = vector.extract_strided_slice %153 {offsets = [0, 256], sizes = [2, 128], strides = [1, 1]} : vector<2x384xf32> to vector<2x128xf32>
    %172 = vector.broadcast %4 : vector<1x128xf32> to vector<2x128xf32>
    %173 = arith.addf %171, %172 : vector<2x128xf32>
    %174 = arith.mulf %161, %173 : vector<2x128xf32>
    %175 = arith.addf %170, %174 : vector<2x128xf32>
    %176 = math.tanh %175 : vector<2x128xf32>
    %cst_43 = arith.constant 1.000000e+00 : f32
    %177 = vector.broadcast %cst_43 : f32 to vector<2x128xf32>
    %178 = arith.subf %177, %169 : vector<2x128xf32>
    %179 = arith.mulf %178, %176 : vector<2x128xf32>
    %180 = arith.mulf %169, %145 : vector<2x128xf32>
    %181 = arith.addf %179, %180 : vector<2x128xf32>
    %182 = arith.index_cast %c4_i32 : i32 to index
    %c0_44 = arith.constant 0 : index
    %c0_45 = arith.constant 0 : index
    %183 = vector.load %arg4[%182, %c0_44, %c0_45] : memref<8x2x128xf32, #tpu.memory_space<vmem>>, vector<1x2x128xf32>
    %184 = vector.shape_cast %183 : vector<1x2x128xf32> to vector<2x128xf32>
    %185 = vector.shape_cast %181 : vector<2x128xf32> to vector<1x2x128xf32>
    tpu.vector_store %arg4[%182, %c0_44, %c0_45], %185 {strides = array<i32>} : memref<8x2x128xf32, #tpu.memory_space<vmem>>, vector<1x2x128xf32>,
    %c5_i32 = arith.constant 5 : i32
    %186 = arith.index_cast %c5_i32 : i32 to index
    %c0_46 = arith.constant 0 : index
    %c0_47 = arith.constant 0 : index
    %187 = vector.load %arg1[%186, %c0_46, %c0_47] : memref<8x2x384xf32, #tpu.memory_space<vmem>>, vector<1x2x384xf32>
    %188 = vector.shape_cast %187 : vector<1x2x384xf32> to vector<2x384xf32>
    %cst_48 = arith.constant dense<0.000000e+00> : vector<2x384xf32>
    %189 = tpu.matmul %181, %3, %cst_48 {dimension_numbers = #tpu.dot_dimension_numbers<[1], [0], [0], [1], [0, 0, 1, 1], [], []>} : vector<2x128xf32>, vector<128x384xf32>, vector<2x384xf32> -> vector<2x384xf32>
    %190 = vector.extract_strided_slice %188 {offsets = [0, 0], sizes = [2, 128], strides = [1, 1]} : vector<2x384xf32> to vector<2x128xf32>
    %191 = vector.extract_strided_slice %189 {offsets = [0, 0], sizes = [2, 128], strides = [1, 1]} : vector<2x384xf32> to vector<2x128xf32>
    %192 = arith.addf %190, %191 : vector<2x128xf32>
    %193 = arith.negf %192 : vector<2x128xf32>
    %194 = math.exp %193 : vector<2x128xf32>
    %cst_49 = arith.constant 1.000000e+00 : f32
    %195 = vector.broadcast %cst_49 : f32 to vector<2x128xf32>
    %196 = arith.addf %195, %194 : vector<2x128xf32>
    %197 = arith.divf %195, %196 : vector<2x128xf32>
    %198 = vector.extract_strided_slice %188 {offsets = [0, 128], sizes = [2, 128], strides = [1, 1]} : vector<2x384xf32> to vector<2x128xf32>
    %199 = vector.extract_strided_slice %189 {offsets = [0, 128], sizes = [2, 128], strides = [1, 1]} : vector<2x384xf32> to vector<2x128xf32>
    %200 = arith.addf %198, %199 : vector<2x128xf32>
    %201 = arith.negf %200 : vector<2x128xf32>
    %202 = math.exp %201 : vector<2x128xf32>
    %cst_50 = arith.constant 1.000000e+00 : f32
    %203 = vector.broadcast %cst_50 : f32 to vector<2x128xf32>
    %204 = arith.addf %203, %202 : vector<2x128xf32>
    %205 = arith.divf %203, %204 : vector<2x128xf32>
    %206 = vector.extract_strided_slice %188 {offsets = [0, 256], sizes = [2, 128], strides = [1, 1]} : vector<2x384xf32> to vector<2x128xf32>
    %207 = vector.extract_strided_slice %189 {offsets = [0, 256], sizes = [2, 128], strides = [1, 1]} : vector<2x384xf32> to vector<2x128xf32>
    %208 = vector.broadcast %4 : vector<1x128xf32> to vector<2x128xf32>
    %209 = arith.addf %207, %208 : vector<2x128xf32>
    %210 = arith.mulf %197, %209 : vector<2x128xf32>
    %211 = arith.addf %206, %210 : vector<2x128xf32>
    %212 = math.tanh %211 : vector<2x128xf32>
    %cst_51 = arith.constant 1.000000e+00 : f32
    %213 = vector.broadcast %cst_51 : f32 to vector<2x128xf32>
    %214 = arith.subf %213, %205 : vector<2x128xf32>
    %215 = arith.mulf %214, %212 : vector<2x128xf32>
    %216 = arith.mulf %205, %181 : vector<2x128xf32>
    %217 = arith.addf %215, %216 : vector<2x128xf32>
    %218 = arith.index_cast %c5_i32 : i32 to index
    %c0_52 = arith.constant 0 : index
    %c0_53 = arith.constant 0 : index
    %219 = vector.load %arg4[%218, %c0_52, %c0_53] : memref<8x2x128xf32, #tpu.memory_space<vmem>>, vector<1x2x128xf32>
    %220 = vector.shape_cast %219 : vector<1x2x128xf32> to vector<2x128xf32>
    %221 = vector.shape_cast %217 : vector<2x128xf32> to vector<1x2x128xf32>
    tpu.vector_store %arg4[%218, %c0_52, %c0_53], %221 {strides = array<i32>} : memref<8x2x128xf32, #tpu.memory_space<vmem>>, vector<1x2x128xf32>,
    %c6_i32 = arith.constant 6 : i32
    %222 = arith.index_cast %c6_i32 : i32 to index
    %c0_54 = arith.constant 0 : index
    %c0_55 = arith.constant 0 : index
    %223 = vector.load %arg1[%222, %c0_54, %c0_55] : memref<8x2x384xf32, #tpu.memory_space<vmem>>, vector<1x2x384xf32>
    %224 = vector.shape_cast %223 : vector<1x2x384xf32> to vector<2x384xf32>
    %cst_56 = arith.constant dense<0.000000e+00> : vector<2x384xf32>
    %225 = tpu.matmul %217, %3, %cst_56 {dimension_numbers = #tpu.dot_dimension_numbers<[1], [0], [0], [1], [0, 0, 1, 1], [], []>} : vector<2x128xf32>, vector<128x384xf32>, vector<2x384xf32> -> vector<2x384xf32>
    %226 = vector.extract_strided_slice %224 {offsets = [0, 0], sizes = [2, 128], strides = [1, 1]} : vector<2x384xf32> to vector<2x128xf32>
    %227 = vector.extract_strided_slice %225 {offsets = [0, 0], sizes = [2, 128], strides = [1, 1]} : vector<2x384xf32> to vector<2x128xf32>
    %228 = arith.addf %226, %227 : vector<2x128xf32>
    %229 = arith.negf %228 : vector<2x128xf32>
    %230 = math.exp %229 : vector<2x128xf32>
    %cst_57 = arith.constant 1.000000e+00 : f32
    %231 = vector.broadcast %cst_57 : f32 to vector<2x128xf32>
    %232 = arith.addf %231, %230 : vector<2x128xf32>
    %233 = arith.divf %231, %232 : vector<2x128xf32>
    %234 = vector.extract_strided_slice %224 {offsets = [0, 128], sizes = [2, 128], strides = [1, 1]} : vector<2x384xf32> to vector<2x128xf32>
    %235 = vector.extract_strided_slice %225 {offsets = [0, 128], sizes = [2, 128], strides = [1, 1]} : vector<2x384xf32> to vector<2x128xf32>
    %236 = arith.addf %234, %235 : vector<2x128xf32>
    %237 = arith.negf %236 : vector<2x128xf32>
    %238 = math.exp %237 : vector<2x128xf32>
    %cst_58 = arith.constant 1.000000e+00 : f32
    %239 = vector.broadcast %cst_58 : f32 to vector<2x128xf32>
    %240 = arith.addf %239, %238 : vector<2x128xf32>
    %241 = arith.divf %239, %240 : vector<2x128xf32>
    %242 = vector.extract_strided_slice %224 {offsets = [0, 256], sizes = [2, 128], strides = [1, 1]} : vector<2x384xf32> to vector<2x128xf32>
    %243 = vector.extract_strided_slice %225 {offsets = [0, 256], sizes = [2, 128], strides = [1, 1]} : vector<2x384xf32> to vector<2x128xf32>
    %244 = vector.broadcast %4 : vector<1x128xf32> to vector<2x128xf32>
    %245 = arith.addf %243, %244 : vector<2x128xf32>
    %246 = arith.mulf %233, %245 : vector<2x128xf32>
    %247 = arith.addf %242, %246 : vector<2x128xf32>
    %248 = math.tanh %247 : vector<2x128xf32>
    %cst_59 = arith.constant 1.000000e+00 : f32
    %249 = vector.broadcast %cst_59 : f32 to vector<2x128xf32>
    %250 = arith.subf %249, %241 : vector<2x128xf32>
    %251 = arith.mulf %250, %248 : vector<2x128xf32>
    %252 = arith.mulf %241, %217 : vector<2x128xf32>
    %253 = arith.addf %251, %252 : vector<2x128xf32>
    %254 = arith.index_cast %c6_i32 : i32 to index
    %c0_60 = arith.constant 0 : index
    %c0_61 = arith.constant 0 : index
    %255 = vector.load %arg4[%254, %c0_60, %c0_61] : memref<8x2x128xf32, #tpu.memory_space<vmem>>, vector<1x2x128xf32>
    %256 = vector.shape_cast %255 : vector<1x2x128xf32> to vector<2x128xf32>
    %257 = vector.shape_cast %253 : vector<2x128xf32> to vector<1x2x128xf32>
    tpu.vector_store %arg4[%254, %c0_60, %c0_61], %257 {strides = array<i32>} : memref<8x2x128xf32, #tpu.memory_space<vmem>>, vector<1x2x128xf32>,
    %c7_i32 = arith.constant 7 : i32
    %258 = arith.index_cast %c7_i32 : i32 to index
    %c0_62 = arith.constant 0 : index
    %c0_63 = arith.constant 0 : index
    %259 = vector.load %arg1[%258, %c0_62, %c0_63] : memref<8x2x384xf32, #tpu.memory_space<vmem>>, vector<1x2x384xf32>
    %260 = vector.shape_cast %259 : vector<1x2x384xf32> to vector<2x384xf32>
    %cst_64 = arith.constant dense<0.000000e+00> : vector<2x384xf32>
    %261 = tpu.matmul %253, %3, %cst_64 {dimension_numbers = #tpu.dot_dimension_numbers<[1], [0], [0], [1], [0, 0, 1, 1], [], []>} : vector<2x128xf32>, vector<128x384xf32>, vector<2x384xf32> -> vector<2x384xf32>
    %262 = vector.extract_strided_slice %260 {offsets = [0, 0], sizes = [2, 128], strides = [1, 1]} : vector<2x384xf32> to vector<2x128xf32>
    %263 = vector.extract_strided_slice %261 {offsets = [0, 0], sizes = [2, 128], strides = [1, 1]} : vector<2x384xf32> to vector<2x128xf32>
    %264 = arith.addf %262, %263 : vector<2x128xf32>
    %265 = arith.negf %264 : vector<2x128xf32>
    %266 = math.exp %265 : vector<2x128xf32>
    %cst_65 = arith.constant 1.000000e+00 : f32
    %267 = vector.broadcast %cst_65 : f32 to vector<2x128xf32>
    %268 = arith.addf %267, %266 : vector<2x128xf32>
    %269 = arith.divf %267, %268 : vector<2x128xf32>
    %270 = vector.extract_strided_slice %260 {offsets = [0, 128], sizes = [2, 128], strides = [1, 1]} : vector<2x384xf32> to vector<2x128xf32>
    %271 = vector.extract_strided_slice %261 {offsets = [0, 128], sizes = [2, 128], strides = [1, 1]} : vector<2x384xf32> to vector<2x128xf32>
    %272 = arith.addf %270, %271 : vector<2x128xf32>
    %273 = arith.negf %272 : vector<2x128xf32>
    %274 = math.exp %273 : vector<2x128xf32>
    %cst_66 = arith.constant 1.000000e+00 : f32
    %275 = vector.broadcast %cst_66 : f32 to vector<2x128xf32>
    %276 = arith.addf %275, %274 : vector<2x128xf32>
    %277 = arith.divf %275, %276 : vector<2x128xf32>
    %278 = vector.extract_strided_slice %260 {offsets = [0, 256], sizes = [2, 128], strides = [1, 1]} : vector<2x384xf32> to vector<2x128xf32>
    %279 = vector.extract_strided_slice %261 {offsets = [0, 256], sizes = [2, 128], strides = [1, 1]} : vector<2x384xf32> to vector<2x128xf32>
    %280 = vector.broadcast %4 : vector<1x128xf32> to vector<2x128xf32>
    %281 = arith.addf %279, %280 : vector<2x128xf32>
    %282 = arith.mulf %269, %281 : vector<2x128xf32>
    %283 = arith.addf %278, %282 : vector<2x128xf32>
    %284 = math.tanh %283 : vector<2x128xf32>
    %cst_67 = arith.constant 1.000000e+00 : f32
    %285 = vector.broadcast %cst_67 : f32 to vector<2x128xf32>
    %286 = arith.subf %285, %277 : vector<2x128xf32>
    %287 = arith.mulf %286, %284 : vector<2x128xf32>
    %288 = arith.mulf %277, %253 : vector<2x128xf32>
    %289 = arith.addf %287, %288 : vector<2x128xf32>
    %290 = arith.index_cast %c7_i32 : i32 to index
    %c0_68 = arith.constant 0 : index
    %c0_69 = arith.constant 0 : index
    %291 = vector.load %arg4[%290, %c0_68, %c0_69] : memref<8x2x128xf32, #tpu.memory_space<vmem>>, vector<1x2x128xf32>
    %292 = vector.shape_cast %291 : vector<1x2x128xf32> to vector<2x128xf32>
    %293 = vector.shape_cast %289 : vector<2x128xf32> to vector<1x2x128xf32>
    tpu.vector_store %arg4[%290, %c0_68, %c0_69], %293 {strides = array<i32>} : memref<8x2x128xf32, #tpu.memory_space<vmem>>, vector<1x2x128xf32>,
    %c8_i32 = arith.constant 8 : i32
    %c0_70 = arith.constant 0 : index
    %c0_71 = arith.constant 0 : index
    %294 = vector.load %arg5[%c0_70, %c0_71] : memref<2x128xf32, #tpu.memory_space<vmem>>, vector<2x128xf32>
    tpu.vector_store %arg5[%c0_70, %c0_71], %289 {strides = array<i32>} : memref<2x128xf32, #tpu.memory_space<vmem>>, vector<2x128xf32>,
    return
  }
  func.func @transform_0(%arg0: i32) -> (i32, i32, i32) {
    %c0_i32 = arith.constant 0 : i32
    %c0_i32_0 = arith.constant 0 : i32
    %c0_i32_1 = arith.constant 0 : i32
    return %arg0, %c0_i32, %c0_i32_0 : i32, i32, i32
  }
  func.func @transform_1(%arg0: i32) -> (i32, i32) {
    %c0_i32 = arith.constant 0 : i32
    %c0_i32_0 = arith.constant 0 : i32
    %c0_i32_1 = arith.constant 0 : i32
    return %c0_i32, %c0_i32_0 : i32, i32
  }
  func.func @transform_2(%arg0: i32) -> (i32, i32) {
    %c0_i32 = arith.constant 0 : i32
    %c0_i32_0 = arith.constant 0 : i32
    %c0_i32_1 = arith.constant 0 : i32
    return %c0_i32, %c0_i32_0 : i32, i32
  }
  func.func @transform_3(%arg0: i32) -> (i32, i32, i32) {
    %c0_i32 = arith.constant 0 : i32
    %c0_i32_0 = arith.constant 0 : i32
    %c0_i32_1 = arith.constant 0 : i32
    return %arg0, %c0_i32, %c0_i32_0 : i32, i32, i32
  }
}

</mosaic_0001>

<bundles_post_ra>
// kernel: tpu_custom_call.1
= control target key start
LH: loop header
LB: loop body
LE: loop exit
PB: predicated region body
PF: predicated region fallthrough
CT: control target
= control target key end

     0   :  { %8 = vsyncpa [#allocation4], 0  ;;  %s2960_s0 = inlined_call_operand.hbm [shape: f32[8,2,384], index: 0, kind: input, shape index: {}]   ;;  %s2961_s1 = inlined_call_operand.hbm [shape: f32[128,384], index: 1, kind: input, shape index: {}]   ;;  %s2962_s2 = inlined_call_operand.vmem [shape: f32[1,128], index: 2, kind: input, shape index: {}]   ;;  %s2963_s3 = inlined_call_operand.hbm [shape: f32[8,2,128], index: 3, kind: output, shape index: {}]  }
   0x1   :  { %9 = vsyncpa [#allocation7], 0 }
   0x2   :  { %10 = vsyncpa [#allocation5], 0  ;;  %s2136_s12 = smov [#allocation3]  }
   0x3   :  { %s16_s13 = sshll.u32 %s2136_s12, 4  ;;  %s17_s13 = int_to_ptr.vmem [resolvable:$true] %s16_s13 }
   0x4   :  { %s2078_s14 = scalar_lea.vmem %s17_s13, 768  ;;  %p2083_p1 = scmp.lt.s32.totalorder %s17_s13, %s17_s13 }
   0x5   :  { %p2079_p0 = scmp.ne.s32.totalorder %s17_s13, %s2078_s14  ;;  %p2084_p2 = scmp.lt.s32.totalorder %s2078_s14, %s2078_s14 }
   0x7   :  { %p2085_p3 = por %p2084_p2, %p2083_p1 }
   0x9   :  { %p2086_p4 = pnand %p2085_p3, %p2079_p0 }
   0xb   :  { %2089 = shalt.err (!%p2086_p4)
}
   0xc   :  { %s2137_s15 = smov 96   ;;  %s2138_s16 = smov 6  }
   0xd   :  { %22 = dma.hbm_to_vmem [thread:$0]  %s2960_s0, 768, %s17_s13, [#allocation4], %s2137_s15, %s2137_s15, %s2138_s16  }
   0xe   :  { %s2139_s19 = smov [#allocation6]  }
   0xf   :  { %s28_s20 = sshll.u32 %s2139_s19, 4  ;;  %s29_s20 = int_to_ptr.vmem [resolvable:$true] %s28_s20 }
  0x10   :  { %s2098_s21 = scalar_lea.vmem %s29_s20, 6144  ;;  %p2103_p6 = scmp.lt.s32.totalorder %s29_s20, %s29_s20 }
  0x11   :  { %p2099_p5 = scmp.ne.s32.totalorder %s29_s20, %s2098_s21  ;;  %p2104_p7 = scmp.lt.s32.totalorder %s2098_s21, %s2098_s21 }
  0x13   :  { %p2105_p8 = por %p2104_p7, %p2103_p6 }
  0x15   :  { %p2106_p9 = pnand %p2105_p8, %p2099_p5 }
  0x17   :  { %2109 = shalt.err (!%p2106_p9)
}
  0x18   :  { %s2140_s22 = smov 384   ;;  %s2141_s23 = smov 24  }
  0x19   :  { %34 = dma.hbm_to_vmem [thread:$0]  %s2961_s1, 6144, %s29_s20, [#allocation7], %s2140_s22, %s2140_s22, %s2141_s23  }
  0x1a   :  { %2130 = dma.done.wait [#allocation4], 768  }
  0x1b   :  { %2131 = vsyncadd [#allocation4], 4294966528 }
  0x1c   :  { %2132 = dma.done.wait [#allocation7], 6144  }
  0x1d   :  { %2133 = vsyncadd [#allocation7], 4294961152  ;;  %v2964_v0 = vmov 0.0   ;;  %vm2143_vm0 = vmmov 0   ;;  %v2178_v1 = vld [vmem:[#allocation6 + $0x170] sm:$0xff]  ;;  %v2180_v2 = vld [vmem:[#allocation6 + $0x168] sm:$0xff] }
  0x1e   :  { %1650 = vmatprep.subr.mxu1 %v2964_v0  ;;  %47 = vst [vmem:[#allocation2] sm:$0x3] %v2964_v0  ;;  %163 = vmatprep.mubr.f32.mxu0 %v2964_v0  ;;  %2983 = vst [vmem:[#allocation12_spill] sm:$0xff] %v2178_v1  ;;  %v2182_v3 = vld [vmem:[#allocation6 + $0x158] sm:$0xff]  ;;  %v2185_v4 = vld [vmem:[#allocation6 + $0x150] sm:$0xff] }
  0x1f   :  { %1682 = vmatprep.mubr.msk.f32.mxu1 %vm2143_vm0, %v2964_v0  ;;  %99 = vmatprep.subr.mxu0 %v2178_v1  ;;  %v2188_v5 = vld [vmem:[#allocation6 + $0x140] sm:$0xff]  ;;  %v2191_v6 = vld [vmem:[#allocation6 + $0x138] sm:$0xff]  ;;  %v2194_v7 = vld [vmem:[#allocation6 + $0x128] sm:$0xff] }
  0x20   :  { %100 = vmatpush1.msra.mxu0 %v2180_v2  ;;  %v2197_v8 = vld [vmem:[#allocation6 + $0x120] sm:$0xff]  ;;  %v2200_v9 = vld [vmem:[#allocation6 + $0x110] sm:$0xff]  ;;  %v2203_v10 = vld [vmem:[#allocation6 + $0x108] sm:$0xff] }
  0x21   :  { %101 = vmatprep.subr.mxu0 %v2182_v3  ;;  %v2206_v11 = vld [vmem:[#allocation6 + $0xf8] sm:$0xff]  ;;  %v2209_v12 = vld [vmem:[#allocation6 + $0xf0] sm:$0xff]  ;;  %v2212_v13 = vld [vmem:[#allocation6 + $0xe0] sm:$0xff] }
  0x22   :  { %102 = vmatpush1.msra.mxu0 %v2185_v4  ;;  %v2214_v14 = vld [vmem:[#allocation6 + $0x178] sm:$0xff]  ;;  %v2220_v16 = vld [vmem:[#allocation6 + $0x160] sm:$0xff]  ;;  %v2223_v17 = vld [vmem:[#allocation6 + $0xc8] sm:$0xff] }
  0x23   :  { %103 = vmatprep.subr.mxu0 %v2188_v5  ;;  %v2217_v15 = vld [vmem:[#allocation6 + $0xd8] sm:$0xff]  ;;  %1651 = vmatpush3.msra.mxu1 %v2214_v14  ;;  %v2226_v18 = vld [vmem:[#allocation6 + $0x148] sm:$0xff]  ;;  %v2229_v19 = vld [vmem:[#allocation6 + $0xc0] sm:$0xff] }
  0x24   :  { %104 = vmatpush1.msra.mxu0 %v2191_v6  ;;  %1652 = vmatprep.subr.mxu1 %v2964_v0  ;;  %v2233_v20 = vld [vmem:[#allocation6 + $0xb0] sm:$0xff]  ;;  %v2239_v22 = vld [vmem:[#allocation6 + $0xa8] sm:$0xff]  ;;  %v2243_v23 = vld [vmem:[#allocation6 + $0x98] sm:$0xff] }
  0x25   :  { %105 = vmatprep.subr.mxu0 %v2194_v7  ;;  %1653 = vmatpush3.msra.mxu1 %v2220_v16  ;;  %v2236_v21 = vld [vmem:[#allocation6 + $0x130] sm:$0xff]  ;;  %v2246_v24 = vld [vmem:[#allocation6 + $0x118] sm:$0xff]  ;;  %v2253_v26 = vld [vmem:[#allocation6 + $0x80] sm:$0xff] }
  0x26   :  { %106 = vmatpush1.msra.mxu0 %v2197_v8  ;;  %1654 = vmatprep.subr.mxu1 %v2964_v0  ;;  %v2249_v25 = vld [vmem:[#allocation6 + $0x90] sm:$0xff]  ;;  %v2256_v27 = vld [vmem:[#allocation6 + $0x100] sm:$0xff]  ;;  %v2259_v28 = vld [vmem:[#allocation6 + $0x78] sm:$0xff] }
  0x27   :  { %107 = vmatprep.subr.mxu0 %v2200_v9  ;;  %1655 = vmatpush3.msra.mxu1 %v2226_v18  ;;  %v2263_v29 = vld [vmem:[#allocation6 + $0x68] sm:$0xff]  ;;  %v2269_v31 = vld [vmem:[#allocation6 + $0x60] sm:$0xff]  ;;  %v2273_v32 = vld [vmem:[#allocation6 + $0x50] sm:$0xff] }
  0x28   :  { %108 = vmatpush1.msra.mxu0 %v2203_v10  ;;  %1656 = vmatprep.subr.mxu1 %v2964_v0  ;;  %v2266_v30 = vld [vmem:[#allocation6 + $0xe8] sm:$0xff]  ;;  %v2276_v33 = vld [vmem:[#allocation6 + $0xd0] sm:$0xff]  ;;  %v2283_v35 = vld [vmem:[#allocation6 + $0x38] sm:$0xff] }
  0x29   :  { %109 = vmatprep.subr.mxu0 %v2206_v11  ;;  %1657 = vmatpush3.msra.mxu1 %v2236_v21  ;;  %v2279_v34 = vld [vmem:[#allocation6 + $0x48] sm:$0xff]  ;;  %v2286_v36 = vld [vmem:[#allocation6 + $0xb8] sm:$0xff]  ;;  %v2289_v37 = vld [vmem:[#allocation6 + $0x30] sm:$0xff] }
  0x2a   :  { %110 = vmatpush1.msra.mxu0 %v2209_v12  ;;  %1658 = vmatprep.subr.mxu1 %v2964_v0  ;;  %v2293_v38 = vld [vmem:[#allocation6 + $0x20] sm:$0xff]  ;;  %v2299_v40 = vld [vmem:[#allocation6 + $0x18] sm:$0xff]  ;;  %v2303_v41 = vld [vmem:[#allocation6 + $0x8] sm:$0xff] }
  0x2b   :  { %111 = vmatprep.subr.mxu0 %v2212_v13  ;;  %1659 = vmatpush3.msra.mxu1 %v2246_v24  ;;  %v2296_v39 = vld [vmem:[#allocation6 + $0xa0] sm:$0xff]  ;;  %2984 = vst [vmem:[#allocation13_spill] sm:$0xff] %v2299_v40  ;;  %2985 = vst [vmem:[#allocation14_spill] sm:$0xff] %v2303_v41  ;;  %v2306_v42 = vld [vmem:[#allocation6 + $0x88] sm:$0xff] }
  0x2c   :  { %112 = vmatpush1.msra.mxu0 %v2217_v15  ;;  %1660 = vmatprep.subr.mxu1 %v2964_v0  ;;  %v2309_v43 = vld [vmem:[#allocation6] sm:$0xff]  ;;  %v2313_v44 = vld [vmem:[#allocation2] sm:$0x3]  ;;  %v2316_v45 = vld [vmem:[#allocation6 + $0x70] sm:$0xff] }
  0x2d   :  { %113 = vmatprep.subr.mxu0 %v2223_v17  ;;  %1661 = vmatpush3.msra.mxu1 %v2256_v27  ;;  %2986 = vst [vmem:[#allocation15_spill] sm:$0xff] %v2309_v43  ;;  %v2322_v46 = vld [vmem:[#allocation6 + $0x58] sm:$0xff]  ;;  %v2327_v47 = vld [vmem:[#allocation6 + $0x40] sm:$0xff]  ;;  %v2333_v48 = vld [vmem:[#allocation6 + $0x28] sm:$0xff] }
  0x2e   :  { %114 = vmatpush1.msra.mxu0 %v2229_v19  ;;  %1662 = vmatprep.subr.mxu1 %v2964_v0  ;;  %2987 = vst [vmem:[#allocation16_spill] sm:$0xff] %v2333_v48  ;;  %v2339_v49 = vld [vmem:[#allocation6 + $0x10] sm:$0xff]  ;;  %v2413_v63 = vld [vmem:[%s2962_s2] ss:$0 sm:$0xff] }
  0x2f   :  { %115 = vmatprep.subr.mxu0 %v2233_v20  ;;  %1663 = vmatpush3.msra.mxu1 %v2266_v30  ;;  %2988 = vst [vmem:[#allocation17_spill] sm:$0xff] %v2339_v49  ;;  %v98_v50 = vld [vmem:[#allocation3] sm:$0x3f] }
  0x30   :  { %116 = vmatpush1.msra.mxu0 %v2239_v22  ;;  %1664 = vmatprep.subr.mxu1 %v2964_v0  ;;  %v248_v54 = vrot.slane %v98_v50, 2 }
  0x31   :  { %117 = vmatprep.subr.mxu0 %v2243_v23  ;;  %1665 = vmatpush3.msra.mxu1 %v2276_v33 }
  0x32   :  { %118 = vmatpush1.msra.mxu0 %v2249_v25  ;;  %1666 = vmatprep.subr.mxu1 %v2964_v0 }
  0x33   :  { %119 = vmatprep.subr.mxu0 %v2253_v26  ;;  %1667 = vmatpush3.msra.mxu1 %v2286_v36 }
  0x34   :  { %120 = vmatpush1.msra.mxu0 %v2259_v28  ;;  %1668 = vmatprep.subr.mxu1 %v2964_v0 }
  0x35   :  { %121 = vmatprep.subr.mxu0 %v2263_v29  ;;  %1669 = vmatpush3.msra.mxu1 %v2296_v39 }
  0x36   :  { %122 = vmatpush1.msra.mxu0 %v2269_v31  ;;  %1670 = vmatprep.subr.mxu1 %v2964_v0 }
  0x37   :  { %123 = vmatprep.subr.mxu0 %v2273_v32  ;;  %1671 = vmatpush3.msra.mxu1 %v2306_v42 }
  0x38   :  { %124 = vmatpush1.msra.mxu0 %v2279_v34  ;;  %1672 = vmatprep.subr.mxu1 %v2964_v0 }
  0x39   :  { %125 = vmatprep.subr.mxu0 %v2283_v35  ;;  %1673 = vmatpush3.msra.mxu1 %v2316_v45 }
  0x3a   :  { %126 = vmatpush1.msra.mxu0 %v2289_v37  ;;  %1674 = vmatprep.subr.mxu1 %v2964_v0 }
  0x3b   :  { %127 = vmatprep.subr.mxu0 %v2293_v38  ;;  %1675 = vmatpush3.msra.mxu1 %v2322_v46 }
  0x3c   :  { %128 = vmatpush1.msra.mxu0 %v2299_v40  ;;  %1676 = vmatprep.subr.mxu1 %v2964_v0 }
  0x3d   :  { %129 = vmatprep.subr.mxu0 %v2303_v41  ;;  %1677 = vmatpush3.msra.mxu1 %v2327_v47 }
  0x3e   :  { %130 = vmatpush1.msra.mxu0 %v2309_v43  ;;  %1678 = vmatprep.subr.mxu1 %v2964_v0 }
  0x3f   :  { %164 = vmatmul.mubr.f32.vlgmr.msra.gmra.mxu0 %v2313_v44  ;;  %276 = vmatprep.subr.mxu0 %v2178_v1 }
  0x40   :  { %277 = vmatpush1.msra.mxu0 %v2180_v2  ;;  %1679 = vmatpush3.msra.mxu1 %v2333_v48 }
  0x41   :  { %278 = vmatprep.subr.mxu0 %v2182_v3  ;;  %1680 = vmatprep.subr.mxu1 %v2964_v0 }
  0x42   :  { %279 = vmatpush1.msra.mxu0 %v2185_v4  ;;  %1681 = vmatpush3.msra.mxu1 %v2339_v49 }
  0x43   :  { %280 = vmatprep.subr.mxu0 %v2188_v5  ;;  %1683 = vmatmul.mubr.f32.vlgmr.msra.gmra.mxu1 %v2313_v44 }
  0x44   :  { %281 = vmatpush1.msra.mxu0 %v2191_v6  ;;  %1685 = vmatprep.subr.mxu1 %v2964_v0 }
  0x45   :  { %282 = vmatprep.subr.mxu0 %v2194_v7  ;;  %1686 = vmatpush3.msra.mxu1 %v2214_v14 }
  0x46   :  { %283 = vmatpush1.msra.mxu0 %v2197_v8  ;;  %1687 = vmatprep.subr.mxu1 %v2964_v0 }
  0x47   :  { %284 = vmatprep.subr.mxu0 %v2200_v9  ;;  %1688 = vmatpush3.msra.mxu1 %v2220_v16 }
  0x48   :  { %285 = vmatpush1.msra.mxu0 %v2203_v10  ;;  %1689 = vmatprep.subr.mxu1 %v2964_v0 }
  0x49   :  { %286 = vmatprep.subr.mxu0 %v2206_v11  ;;  %1690 = vmatpush3.msra.mxu1 %v2226_v18 }
  0x4a   :  { %287 = vmatpush1.msra.mxu0 %v2209_v12  ;;  %1691 = vmatprep.subr.mxu1 %v2964_v0 }
  0x4b   :  { %288 = vmatprep.subr.mxu0 %v2212_v13  ;;  %1692 = vmatpush3.msra.mxu1 %v2236_v21 }
  0x4c   :  { %289 = vmatpush1.msra.mxu0 %v2217_v15  ;;  %1693 = vmatprep.subr.mxu1 %v2964_v0 }
  0x4d   :  { %290 = vmatprep.subr.mxu0 %v2223_v17  ;;  %1694 = vmatpush3.msra.mxu1 %v2246_v24 }
  0x4e   :  { %291 = vmatpush1.msra.mxu0 %v2229_v19  ;;  %1695 = vmatprep.subr.mxu1 %v2964_v0 }
  0x4f   :  { %292 = vmatprep.subr.mxu0 %v2233_v20  ;;  %1696 = vmatpush3.msra.mxu1 %v2256_v27 }
  0x50   :  { %293 = vmatpush1.msra.mxu0 %v2239_v22  ;;  %1697 = vmatprep.subr.mxu1 %v2964_v0 }
  0x51   :  { %294 = vmatprep.subr.mxu0 %v2243_v23  ;;  %1698 = vmatpush3.msra.mxu1 %v2266_v30 }
  0x52   :  { %295 = vmatpush1.msra.mxu0 %v2249_v25  ;;  %1699 = vmatprep.subr.mxu1 %v2964_v0 }
  0x53   :  { %296 = vmatprep.subr.mxu0 %v2253_v26  ;;  %1700 = vmatpush3.msra.mxu1 %v2276_v33 }
  0x54   :  { %297 = vmatpush1.msra.mxu0 %v2259_v28  ;;  %1701 = vmatprep.subr.mxu1 %v2964_v0 }
  0x55   :  { %298 = vmatprep.subr.mxu0 %v2263_v29  ;;  %1702 = vmatpush3.msra.mxu1 %v2286_v36 }
  0x56   :  { %299 = vmatpush1.msra.mxu0 %v2269_v31  ;;  %1703 = vmatprep.subr.mxu1 %v2964_v0 }
  0x57   :  { %300 = vmatprep.subr.mxu0 %v2273_v32  ;;  %1704 = vmatpush3.msra.mxu1 %v2296_v39 }
  0x58   :  { %301 = vmatpush1.msra.mxu0 %v2279_v34  ;;  %1705 = vmatprep.subr.mxu1 %v2964_v0 }
  0x59   :  { %302 = vmatprep.subr.mxu0 %v2283_v35  ;;  %1706 = vmatpush3.msra.mxu1 %v2306_v42 }
  0x5a   :  { %303 = vmatpush1.msra.mxu0 %v2289_v37  ;;  %1707 = vmatprep.subr.mxu1 %v2964_v0 }
  0x5b   :  { %304 = vmatprep.subr.mxu0 %v2293_v38  ;;  %1708 = vmatpush3.msra.mxu1 %v2316_v45 }
  0x5c   :  { %305 = vmatpush1.msra.mxu0 %v2299_v40  ;;  %1709 = vmatprep.subr.mxu1 %v2964_v0 }
  0x5d   :  { %306 = vmatprep.subr.mxu0 %v2303_v41  ;;  %1710 = vmatpush3.msra.mxu1 %v2322_v46 }
  0x5e   :  { %307 = vmatpush1.msra.mxu0 %v2309_v43  ;;  %340 = vmatprep.mubr.f32.mxu0 %v2964_v0 }
  0x5f   :  { %1711 = vmatprep.subr.mxu1 %v2964_v0  ;;  %1717 = vmatprep.mubr.msk.f32.mxu1 %vm2143_vm0, %v2964_v0 }
  0x60   :  { %1712 = vmatpush3.msra.mxu1 %v2327_v47  ;;  %448 = vmatprep.subr.mxu0 %v2178_v1 }
  0x61   :  { %1713 = vmatprep.subr.mxu1 %v2964_v0 }
  0x62   :  { %1714 = vmatpush3.msra.mxu1 %v2333_v48 }
  0x63   :  { %1715 = vmatprep.subr.mxu1 %v2964_v0 }
  0x64   :  { %1716 = vmatpush3.msra.mxu1 %v2339_v49 }
  0x65   :  { %1720 = vmatprep.subr.mxu1 %v2964_v0 }
  0xff   :  { %v165_v51 = vpop.f32.mrf.mxu0 }
 0x100   :  { %v240_v52 = vadd.f32 %v165_v51, %v98_v50 }
 0x101   :  { %v167_v55 = vpop.f32.mrf.mxu0 }
 0x102   :  { %v1497_v53 = vmul.f32 -1.442695, %v240_v52  ;;  %v250_v56 = vadd.f32 %v248_v54, %v167_v55  ;;  %v265_v52 = vrot.slane %v98_v50, 4 }
 0x103   :  { %v236_v57 = vpop.f32.mrf.mxu1 }
 0x104   :  { %1941 = vpow2.f32 %v1497_v53  ;;  %v1498_v58 = vmul.f32 -1.442695, %v250_v56  ;;  %v263_v51 = vadd.f32 %v2413_v63, %v236_v57 }
 0x105   :  { %v1684_v59 = vpop.f32.mrf.mxu1 }
 0x106   :  { %1943 = vpow2.f32 %v1498_v58 }
 0x111   :  { %v1942_v60 = vpop.eup %1941 }
 0x112   :  { %v244_v61 = vadd.f32 1.0, %v1942_v60 }
 0x113   :  { %v1944_v62 = vpop.eup %1943 }
 0x114   :  { %1945 = vrcp.f32 %v244_v61  ;;  %v254_v0 = vadd.f32 1.0, %v1944_v62 }
 0x116   :  { %1947 = vrcp.f32 %v254_v0  ;;  %v2989_v0 = vmov 0.0  }
 0x121   :  { %v1946_v1 = vpop.eup %1945 }
 0x122   :  { %v264_v53 = vmul.f32 %v1946_v1, %v263_v51  ;;  %v2990_v1 = vld [vmem:[#allocation12_spill] sm:$0xff] }
 0x123   :  { %v1948_v55 = vpop.eup %1947 }
 0x124   :  { %v267_v54 = vadd.f32 %v265_v52, %v264_v53  ;;  %v269_v56 = vsub.f32 1.0, %v1948_v55  ;;  %v271_v60 = vmul.f32 %v1948_v55, %v2313_v44  ;;  %v275_v44 = vld [vmem:[#allocation3 + $0x6] sm:$0x3f] }
 0x125   :  { %v425_v53 = vrot.slane %v275_v44, 2 }
 0x126   :  { %1949 = vtanh.f32 %v267_v54 }
 0x133   :  { %v1950_v58 = vpop.eup %1949 }
 0x134   :  { %v270_v59 = vmul.f32 %v1950_v58, %v269_v56 }
 0x136   :  { %v2417_v61 = vadd.f32 %v271_v60, %v270_v59 }
 0x138   :  { %273 = vst [vmem:[#allocation8] sm:$0x3] %v2417_v61  ;;  %341 = vmatmul.mubr.f32.vlgmr.msra.gmra.mxu0 %v2417_v61  ;;  %1718 = vmatmul.mubr.f32.vlgmr.msra.gmra.mxu1 %v2417_v61 }
 0x139   :  { %449 = vmatpush1.msra.mxu0 %v2180_v2  ;;  %1721 = vmatpush3.msra.mxu1 %v2214_v14 }
 0x13a   :  { %450 = vmatprep.subr.mxu0 %v2182_v3  ;;  %1722 = vmatprep.subr.mxu1 %v2989_v0 }
 0x13b   :  { %451 = vmatpush1.msra.mxu0 %v2185_v4  ;;  %1723 = vmatpush3.msra.mxu1 %v2220_v16 }
 0x13c   :  { %452 = vmatprep.subr.mxu0 %v2188_v5  ;;  %1724 = vmatprep.subr.mxu1 %v2989_v0 }
 0x13d   :  { %453 = vmatpush1.msra.mxu0 %v2191_v6  ;;  %1725 = vmatpush3.msra.mxu1 %v2226_v18 }
 0x13e   :  { %454 = vmatprep.subr.mxu0 %v2194_v7  ;;  %1726 = vmatprep.subr.mxu1 %v2989_v0 }
 0x13f   :  { %455 = vmatpush1.msra.mxu0 %v2197_v8  ;;  %1727 = vmatpush3.msra.mxu1 %v2236_v21 }
 0x140   :  { %456 = vmatprep.subr.mxu0 %v2200_v9  ;;  %1728 = vmatprep.subr.mxu1 %v2989_v0 }
 0x141   :  { %457 = vmatpush1.msra.mxu0 %v2203_v10  ;;  %1729 = vmatpush3.msra.mxu1 %v2246_v24 }
 0x142   :  { %458 = vmatprep.subr.mxu0 %v2206_v11  ;;  %1730 = vmatprep.subr.mxu1 %v2989_v0 }
 0x143   :  { %459 = vmatpush1.msra.mxu0 %v2209_v12  ;;  %1731 = vmatpush3.msra.mxu1 %v2256_v27 }
 0x144   :  { %460 = vmatprep.subr.mxu0 %v2212_v13  ;;  %1732 = vmatprep.subr.mxu1 %v2989_v0 }
 0x145   :  { %461 = vmatpush1.msra.mxu0 %v2217_v15  ;;  %1733 = vmatpush3.msra.mxu1 %v2266_v30 }
 0x146   :  { %462 = vmatprep.subr.mxu0 %v2223_v17  ;;  %1734 = vmatprep.subr.mxu1 %v2989_v0 }
 0x147   :  { %463 = vmatpush1.msra.mxu0 %v2229_v19  ;;  %1735 = vmatpush3.msra.mxu1 %v2276_v33 }
 0x148   :  { %464 = vmatprep.subr.mxu0 %v2233_v20  ;;  %1736 = vmatprep.subr.mxu1 %v2989_v0 }
 0x149   :  { %465 = vmatpush1.msra.mxu0 %v2239_v22  ;;  %1737 = vmatpush3.msra.mxu1 %v2286_v36 }
 0x14a   :  { %466 = vmatprep.subr.mxu0 %v2243_v23  ;;  %1738 = vmatprep.subr.mxu1 %v2989_v0 }
 0x14b   :  { %467 = vmatpush1.msra.mxu0 %v2249_v25  ;;  %1739 = vmatpush3.msra.mxu1 %v2296_v39 }
 0x14c   :  { %468 = vmatprep.subr.mxu0 %v2253_v26  ;;  %1740 = vmatprep.subr.mxu1 %v2989_v0 }
 0x14d   :  { %469 = vmatpush1.msra.mxu0 %v2259_v28  ;;  %1741 = vmatpush3.msra.mxu1 %v2306_v42 }
 0x14e   :  { %470 = vmatprep.subr.mxu0 %v2263_v29  ;;  %1742 = vmatprep.subr.mxu1 %v2989_v0 }
 0x14f   :  { %471 = vmatpush1.msra.mxu0 %v2269_v31  ;;  %1743 = vmatpush3.msra.mxu1 %v2316_v45 }
 0x150   :  { %472 = vmatprep.subr.mxu0 %v2273_v32  ;;  %1744 = vmatprep.subr.mxu1 %v2989_v0 }
 0x151   :  { %473 = vmatpush1.msra.mxu0 %v2279_v34  ;;  %1745 = vmatpush3.msra.mxu1 %v2322_v46 }
 0x152   :  { %474 = vmatprep.subr.mxu0 %v2283_v35  ;;  %1746 = vmatprep.subr.mxu1 %v2989_v0 }
 0x153   :  { %475 = vmatpush1.msra.mxu0 %v2289_v37  ;;  %1747 = vmatpush3.msra.mxu1 %v2327_v47 }
 0x154   :  { %476 = vmatprep.subr.mxu0 %v2293_v38  ;;  %1748 = vmatprep.subr.mxu1 %v2989_v0 }
 0x155   :  { %477 = vmatpush1.msra.mxu0 %v2299_v40  ;;  %1749 = vmatpush3.msra.mxu1 %v2333_v48 }
 0x156   :  { %478 = vmatprep.subr.mxu0 %v2303_v41  ;;  %1750 = vmatprep.subr.mxu1 %v2989_v0 }
 0x157   :  { %479 = vmatpush1.msra.mxu0 %v2309_v43  ;;  %512 = vmatprep.mubr.f32.mxu0 %v2989_v0 }
 0x158   :  { %1751 = vmatpush3.msra.mxu1 %v2339_v49  ;;  %1752 = vmatprep.mubr.msk.f32.mxu1 %vm2143_vm0, %v2989_v0 }
 0x159   :  { %620 = vmatprep.subr.mxu0 %v2990_v1  ;;  %1755 = vmatprep.subr.mxu1 %v2989_v0  ;;  %v436_v1 = vrot.slane %v275_v44, 4 }
 0x1f8   :  { %v342_v50 = vpop.f32.mrf.mxu0  ;;  %v413_v57 = vpop.f32.mrf.mxu1 }
 0x1f9   :  { %v417_v62 = vadd.f32 %v342_v50, %v275_v44  ;;  %v434_v43 = vadd.f32 %v2413_v63, %v413_v57 }
 0x1fa   :  { %v1719_v51 = vpop.f32.mrf.mxu1  ;;  %v344_v54 = vpop.f32.mrf.mxu0 }
 0x1fb   :  { %v1500_v52 = vmul.f32 -1.442695, %v417_v62  ;;  %v427_v55 = vadd.f32 %v425_v53, %v344_v54 }
 0x1fd   :  { %1951 = vpow2.f32 %v1500_v52  ;;  %v1501_v56 = vmul.f32 -1.442695, %v427_v55 }
 0x1ff   :  { %1953 = vpow2.f32 %v1501_v56 }
 0x20a   :  { %v1952_v58 = vpop.eup %1951 }
 0x20b   :  { %v421_v59 = vadd.f32 1.0, %v1952_v58 }
 0x20c   :  { %v1954_v60 = vpop.eup %1953 }
 0x20d   :  { %1955 = vrcp.f32 %v421_v59  ;;  %v431_v49 = vadd.f32 1.0, %v1954_v60 }
 0x20f   :  { %1957 = vrcp.f32 %v431_v49  ;;  %v2995_v49 = vld [vmem:[#allocation17_spill] sm:$0xff] }
 0x21a   :  { %v1956_v41 = vpop.eup %1955 }
 0x21b   :  { %v435_v48 = vmul.f32 %v1956_v41, %v434_v43  ;;  %v2992_v41 = vld [vmem:[#allocation16_spill] sm:$0xff]  ;;  %v2993_v43 = vld [vmem:[#allocation14_spill] sm:$0xff] }
 0x21c   :  { %v1958_v62 = vpop.eup %1957 }
 0x21d   :  { %v438_v50 = vadd.f32 %v436_v1, %v435_v48  ;;  %v440_v51 = vsub.f32 1.0, %v1958_v62  ;;  %v442_v53 = vmul.f32 %v1958_v62, %v2417_v61  ;;  %v2994_v48 = vld [vmem:[#allocation15_spill] sm:$0xff]  ;;  %v2996_v61 = vld [vmem:[#allocation12_spill] sm:$0xff]  ;;  %v447_v1 = vld [vmem:[#allocation3 + $0xc] sm:$0x3f] }
 0x21e   :  { %v597_v59 = vrot.slane %v447_v1, 2 }
 0x21f   :  { %1959 = vtanh.f32 %v438_v50 }
 0x22c   :  { %v1960_v40 = vpop.eup %1959 }
 0x22d   :  { %v441_v52 = vmul.f32 %v1960_v40, %v440_v51  ;;  %v2991_v40 = vld [vmem:[#allocation13_spill] sm:$0xff] }
 0x22f   :  { %v2491_v54 = vadd.f32 %v442_v53, %v441_v52 }
 0x231   :  { %445 = vst [vmem:[#allocation8 + $0x2] sm:$0x3] %v2491_v54  ;;  %513 = vmatmul.mubr.f32.vlgmr.msra.gmra.mxu0 %v2491_v54  ;;  %1753 = vmatmul.mubr.f32.vlgmr.msra.gmra.mxu1 %v2491_v54 }
 0x232   :  { %621 = vmatpush1.msra.mxu0 %v2180_v2  ;;  %1756 = vmatpush3.msra.mxu1 %v2214_v14 }
 0x233   :  { %622 = vmatprep.subr.mxu0 %v2182_v3  ;;  %1757 = vmatprep.subr.mxu1 %v2989_v0 }
 0x234   :  { %623 = vmatpush1.msra.mxu0 %v2185_v4  ;;  %1758 = vmatpush3.msra.mxu1 %v2220_v16 }
 0x235   :  { %624 = vmatprep.subr.mxu0 %v2188_v5  ;;  %1759 = vmatprep.subr.mxu1 %v2989_v0 }
 0x236   :  { %625 = vmatpush1.msra.mxu0 %v2191_v6  ;;  %1760 = vmatpush3.msra.mxu1 %v2226_v18 }
 0x237   :  { %626 = vmatprep.subr.mxu0 %v2194_v7  ;;  %1761 = vmatprep.subr.mxu1 %v2989_v0 }
 0x238   :  { %627 = vmatpush1.msra.mxu0 %v2197_v8  ;;  %1762 = vmatpush3.msra.mxu1 %v2236_v21 }
 0x239   :  { %628 = vmatprep.subr.mxu0 %v2200_v9  ;;  %1763 = vmatprep.subr.mxu1 %v2989_v0 }
 0x23a   :  { %629 = vmatpush1.msra.mxu0 %v2203_v10  ;;  %1764 = vmatpush3.msra.mxu1 %v2246_v24 }
 0x23b   :  { %630 = vmatprep.subr.mxu0 %v2206_v11  ;;  %1765 = vmatprep.subr.mxu1 %v2989_v0 }
 0x23c   :  { %631 = vmatpush1.msra.mxu0 %v2209_v12  ;;  %1766 = vmatpush3.msra.mxu1 %v2256_v27 }
 0x23d   :  { %632 = vmatprep.subr.mxu0 %v2212_v13  ;;  %1767 = vmatprep.subr.mxu1 %v2989_v0 }
 0x23e   :  { %633 = vmatpush1.msra.mxu0 %v2217_v15  ;;  %1768 = vmatpush3.msra.mxu1 %v2266_v30 }
 0x23f   :  { %634 = vmatprep.subr.mxu0 %v2223_v17  ;;  %1769 = vmatprep.subr.mxu1 %v2989_v0 }
 0x240   :  { %635 = vmatpush1.msra.mxu0 %v2229_v19  ;;  %1770 = vmatpush3.msra.mxu1 %v2276_v33 }
 0x241   :  { %636 = vmatprep.subr.mxu0 %v2233_v20  ;;  %1771 = vmatprep.subr.mxu1 %v2989_v0 }
 0x242   :  { %637 = vmatpush1.msra.mxu0 %v2239_v22  ;;  %1772 = vmatpush3.msra.mxu1 %v2286_v36 }
 0x243   :  { %638 = vmatprep.subr.mxu0 %v2243_v23  ;;  %1773 = vmatprep.subr.mxu1 %v2989_v0 }
 0x244   :  { %639 = vmatpush1.msra.mxu0 %v2249_v25  ;;  %1774 = vmatpush3.msra.mxu1 %v2296_v39 }
 0x245   :  { %640 = vmatprep.subr.mxu0 %v2253_v26  ;;  %1775 = vmatprep.subr.mxu1 %v2989_v0 }
 0x246   :  { %641 = vmatpush1.msra.mxu0 %v2259_v28  ;;  %1776 = vmatpush3.msra.mxu1 %v2306_v42 }
 0x247   :  { %642 = vmatprep.subr.mxu0 %v2263_v29  ;;  %1777 = vmatprep.subr.mxu1 %v2989_v0 }
 0x248   :  { %643 = vmatpush1.msra.mxu0 %v2269_v31  ;;  %1778 = vmatpush3.msra.mxu1 %v2316_v45 }
 0x249   :  { %644 = vmatprep.subr.mxu0 %v2273_v32  ;;  %1779 = vmatprep.subr.mxu1 %v2989_v0 }
 0x24a   :  { %645 = vmatpush1.msra.mxu0 %v2279_v34  ;;  %1780 = vmatpush3.msra.mxu1 %v2322_v46 }
 0x24b   :  { %646 = vmatprep.subr.mxu0 %v2283_v35  ;;  %1781 = vmatprep.subr.mxu1 %v2989_v0 }
 0x24c   :  { %647 = vmatpush1.msra.mxu0 %v2289_v37  ;;  %1782 = vmatpush3.msra.mxu1 %v2327_v47 }
 0x24d   :  { %648 = vmatprep.subr.mxu0 %v2293_v38  ;;  %1783 = vmatprep.subr.mxu1 %v2989_v0 }
 0x24e   :  { %649 = vmatpush1.msra.mxu0 %v2991_v40  ;;  %1784 = vmatpush3.msra.mxu1 %v2992_v41 }
 0x24f   :  { %650 = vmatprep.subr.mxu0 %v2993_v43  ;;  %1785 = vmatprep.subr.mxu1 %v2989_v0 }
 0x250   :  { %651 = vmatpush1.msra.mxu0 %v2994_v48  ;;  %684 = vmatprep.mubr.f32.mxu0 %v2989_v0 }
 0x251   :  { %1786 = vmatpush3.msra.mxu1 %v2995_v49  ;;  %1787 = vmatprep.mubr.msk.f32.mxu1 %vm2143_vm0, %v2989_v0 }
 0x252   :  { %792 = vmatprep.subr.mxu0 %v2996_v61  ;;  %1790 = vmatprep.subr.mxu1 %v2989_v0  ;;  %v608_v61 = vrot.slane %v447_v1, 4 }
 0x2f1   :  { %v514_v44 = vpop.f32.mrf.mxu0  ;;  %v585_v57 = vpop.f32.mrf.mxu1 }
 0x2f2   :  { %v589_v55 = vadd.f32 %v514_v44, %v447_v1  ;;  %v606_v48 = vadd.f32 %v2413_v63, %v585_v57 }
 0x2f3   :  { %v1754_v56 = vpop.f32.mrf.mxu1  ;;  %v516_v60 = vpop.f32.mrf.mxu0 }
 0x2f4   :  { %v1502_v58 = vmul.f32 -1.442695, %v589_v55  ;;  %v599_v50 = vadd.f32 %v597_v59, %v516_v60 }
 0x2f6   :  { %1961 = vpow2.f32 %v1502_v58  ;;  %v1503_v62 = vmul.f32 -1.442695, %v599_v50 }
 0x2f8   :  { %1963 = vpow2.f32 %v1503_v62 }
 0x303   :  { %v1962_v51 = vpop.eup %1961 }
 0x304   :  { %v593_v52 = vadd.f32 1.0, %v1962_v51 }
 0x305   :  { %v1964_v53 = vpop.eup %1963 }
 0x306   :  { %1965 = vrcp.f32 %v593_v52  ;;  %v603_v49 = vadd.f32 1.0, %v1964_v53 }
 0x308   :  { %1967 = vrcp.f32 %v603_v49 }
 0x313   :  { %v1966_v43 = vpop.eup %1965 }
 0x314   :  { %v607_v41 = vmul.f32 %v1966_v43, %v606_v48 }
 0x315   :  { %v1968_v55 = vpop.eup %1967 }
 0x316   :  { %v610_v44 = vadd.f32 %v608_v61, %v607_v41  ;;  %v612_v56 = vsub.f32 1.0, %v1968_v55  ;;  %v614_v59 = vmul.f32 %v1968_v55, %v2491_v54 }
 0x318   :  { %1969 = vtanh.f32 %v610_v44 }
 0x325   :  { %v1970_v40 = vpop.eup %1969 }
 0x326   :  { %v613_v58 = vmul.f32 %v1970_v40, %v612_v56 }
 0x328   :  { %v2565_v60 = vadd.f32 %v614_v59, %v613_v58  ;;  %v2644_v59 = vld [vmem:[#allocation6 + $0x168] sm:$0xff] }
 0x32a   :  { %617 = vst [vmem:[#allocation8 + $0x4] sm:$0x3] %v2565_v60  ;;  %685 = vmatmul.mubr.f32.vlgmr.msra.gmra.mxu0 %v2565_v60  ;;  %1788 = vmatmul.mubr.f32.vlgmr.msra.gmra.mxu1 %v2565_v60 }
 0x32b   :  { %793 = vmatpush1.msra.mxu0 %v2180_v2  ;;  %1791 = vmatpush3.msra.mxu1 %v2214_v14  ;;  %v2997_v2 = vld [vmem:[#allocation13_spill] sm:$0xff] }
 0x32c   :  { %794 = vmatprep.subr.mxu0 %v2182_v3  ;;  %1792 = vmatprep.subr.mxu1 %v2989_v0  ;;  %v2998_v3 = vld [vmem:[#allocation16_spill] sm:$0xff] }
 0x32d   :  { %795 = vmatpush1.msra.mxu0 %v2185_v4  ;;  %1793 = vmatpush3.msra.mxu1 %v2220_v16  ;;  %v2999_v4 = vld [vmem:[#allocation14_spill] sm:$0xff] }
 0x32e   :  { %796 = vmatprep.subr.mxu0 %v2188_v5  ;;  %1794 = vmatprep.subr.mxu1 %v2989_v0  ;;  %v3000_v5 = vld [vmem:[#allocation15_spill] sm:$0xff] }
 0x32f   :  { %797 = vmatpush1.msra.mxu0 %v2191_v6  ;;  %1795 = vmatpush3.msra.mxu1 %v2226_v18  ;;  %v3001_v6 = vld [vmem:[#allocation17_spill] sm:$0xff] }
 0x330   :  { %798 = vmatprep.subr.mxu0 %v2194_v7  ;;  %1796 = vmatprep.subr.mxu1 %v2989_v0  ;;  %v3002_v7 = vld [vmem:[#allocation12_spill] sm:$0xff] }
 0x331   :  { %799 = vmatpush1.msra.mxu0 %v2197_v8  ;;  %1797 = vmatpush3.msra.mxu1 %v2236_v21  ;;  %v619_v8 = vld [vmem:[#allocation3 + $0x12] sm:$0x3f] }
 0x332   :  { %800 = vmatprep.subr.mxu0 %v2200_v9  ;;  %1798 = vmatprep.subr.mxu1 %v2989_v0  ;;  %v780_v1 = vrot.slane %v619_v8, 4 }
 0x333   :  { %801 = vmatpush1.msra.mxu0 %v2203_v10  ;;  %1799 = vmatpush3.msra.mxu1 %v2246_v24 }
 0x334   :  { %802 = vmatprep.subr.mxu0 %v2206_v11  ;;  %1800 = vmatprep.subr.mxu1 %v2989_v0 }
 0x335   :  { %803 = vmatpush1.msra.mxu0 %v2209_v12  ;;  %1801 = vmatpush3.msra.mxu1 %v2256_v27 }
 0x336   :  { %804 = vmatprep.subr.mxu0 %v2212_v13  ;;  %1802 = vmatprep.subr.mxu1 %v2989_v0 }
 0x337   :  { %805 = vmatpush1.msra.mxu0 %v2217_v15  ;;  %1803 = vmatpush3.msra.mxu1 %v2266_v30  ;;  %v769_v15 = vrot.slane %v619_v8, 2 }
 0x338   :  { %806 = vmatprep.subr.mxu0 %v2223_v17  ;;  %1804 = vmatprep.subr.mxu1 %v2989_v0 }
 0x339   :  { %807 = vmatpush1.msra.mxu0 %v2229_v19  ;;  %1805 = vmatpush3.msra.mxu1 %v2276_v33 }
 0x33a   :  { %808 = vmatprep.subr.mxu0 %v2233_v20  ;;  %1806 = vmatprep.subr.mxu1 %v2989_v0 }
 0x33b   :  { %809 = vmatpush1.msra.mxu0 %v2239_v22  ;;  %1807 = vmatpush3.msra.mxu1 %v2286_v36 }
 0x33c   :  { %810 = vmatprep.subr.mxu0 %v2243_v23  ;;  %1808 = vmatprep.subr.mxu1 %v2989_v0 }
 0x33d   :  { %811 = vmatpush1.msra.mxu0 %v2249_v25  ;;  %1809 = vmatpush3.msra.mxu1 %v2296_v39 }
 0x33e   :  { %812 = vmatprep.subr.mxu0 %v2253_v26  ;;  %1810 = vmatprep.subr.mxu1 %v2989_v0 }
 0x33f   :  { %813 = vmatpush1.msra.mxu0 %v2259_v28  ;;  %1811 = vmatpush3.msra.mxu1 %v2306_v42 }
 0x340   :  { %814 = vmatprep.subr.mxu0 %v2263_v29  ;;  %1812 = vmatprep.subr.mxu1 %v2989_v0 }
 0x341   :  { %815 = vmatpush1.msra.mxu0 %v2269_v31  ;;  %1813 = vmatpush3.msra.mxu1 %v2316_v45 }
 0x342   :  { %816 = vmatprep.subr.mxu0 %v2273_v32  ;;  %1814 = vmatprep.subr.mxu1 %v2989_v0 }
 0x343   :  { %817 = vmatpush1.msra.mxu0 %v2279_v34  ;;  %1815 = vmatpush3.msra.mxu1 %v2322_v46 }
 0x344   :  { %818 = vmatprep.subr.mxu0 %v2283_v35  ;;  %1816 = vmatprep.subr.mxu1 %v2989_v0 }
 0x345   :  { %819 = vmatpush1.msra.mxu0 %v2289_v37  ;;  %1817 = vmatpush3.msra.mxu1 %v2327_v47 }
 0x346   :  { %820 = vmatprep.subr.mxu0 %v2293_v38  ;;  %1818 = vmatprep.subr.mxu1 %v2989_v0 }
 0x347   :  { %821 = vmatpush1.msra.mxu0 %v2997_v2  ;;  %1819 = vmatpush3.msra.mxu1 %v2998_v3 }
 0x348   :  { %822 = vmatprep.subr.mxu0 %v2999_v4  ;;  %1820 = vmatprep.subr.mxu1 %v2989_v0 }
 0x349   :  { %823 = vmatpush1.msra.mxu0 %v3000_v5  ;;  %856 = vmatprep.mubr.f32.mxu0 %v2989_v0 }
 0x34a   :  { %1821 = vmatpush3.msra.mxu1 %v3001_v6  ;;  %1822 = vmatprep.mubr.msk.f32.mxu1 %vm2143_vm0, %v2989_v0 }
 0x34b   :  { %964 = vmatprep.subr.mxu0 %v3002_v7  ;;  %1825 = vmatprep.subr.mxu1 %v2989_v0  ;;  %v2648_v7 = vld [vmem:[#allocation6 + $0x158] sm:$0xff] }
 0x3ea   :  { %v686_v9 = vpop.f32.mrf.mxu0  ;;  %v757_v10 = vpop.f32.mrf.mxu1 }
 0x3eb   :  { %v761_v11 = vadd.f32 %v686_v9, %v619_v8  ;;  %v778_v57 = vadd.f32 %v2413_v63, %v757_v10  ;;  %v2656_v8 = vld [vmem:[#allocation6 + $0x140] sm:$0xff]  ;;  %v2660_v9 = vld [vmem:[#allocation6 + $0x138] sm:$0xff] }
 0x3ec   :  { %v1789_v12 = vpop.f32.mrf.mxu1  ;;  %v688_v54 = vpop.f32.mrf.mxu0  ;;  %v2668_v10 = vld [vmem:[#allocation6 + $0x120] sm:$0xff] }
 0x3ed   :  { %v1504_v13 = vmul.f32 -1.442695, %v761_v11  ;;  %v771_v40 = vadd.f32 %v769_v15, %v688_v54  ;;  %v2676_v11 = vld [vmem:[#allocation6 + $0x108] sm:$0xff]  ;;  %v2684_v12 = vld [vmem:[#allocation6 + $0xf0] sm:$0xff]  ;;  %v2771_v15 = vld [vmem:[#allocation6 + $0x118] sm:$0xff] }
 0x3ee   :  { %v2777_v54 = vld [vmem:[#allocation6 + $0x100] sm:$0xff] }
 0x3ef   :  { %1971 = vpow2.f32 %v1504_v13  ;;  %v1505_v41 = vmul.f32 -1.442695, %v771_v40  ;;  %v2692_v13 = vld [vmem:[#allocation6 + $0xd8] sm:$0xff]  ;;  %v2783_v40 = vld [vmem:[#allocation6 + $0xe8] sm:$0xff] }
 0x3f1   :  { %1973 = vpow2.f32 %v1505_v41  ;;  %v2786_v41 = vld [vmem:[#allocation6 + $0xc8] sm:$0xff] }
 0x3fc   :  { %v1972_v43 = vpop.eup %1971 }
 0x3fd   :  { %v765_v48 = vadd.f32 1.0, %v1972_v43  ;;  %v2790_v43 = vld [vmem:[#allocation6 + $0xc0] sm:$0xff] }
 0x3fe   :  { %v1974_v49 = vpop.eup %1973 }
 0x3ff   :  { %1975 = vrcp.f32 %v765_v48  ;;  %v775_v61 = vadd.f32 1.0, %v1974_v49  ;;  %v2793_v48 = vld [vmem:[#allocation6 + $0xd0] sm:$0xff] }
 0x400   :  { %v2796_v49 = vld [vmem:[#allocation6 + $0xb0] sm:$0xff] }
 0x401   :  { %1977 = vrcp.f32 %v775_v61  ;;  %v2800_v61 = vld [vmem:[#allocation6 + $0xa8] sm:$0xff] }
 0x40c   :  { %v1976_v50 = vpop.eup %1975 }
 0x40d   :  { %v779_v62 = vmul.f32 %v1976_v50, %v778_v57  ;;  %v2806_v57 = vld [vmem:[#allocation6 + $0x98] sm:$0xff]  ;;  %v2810_v50 = vld [vmem:[#allocation6 + $0x90] sm:$0xff] }
 0x40e   :  { %v1978_v52 = vpop.eup %1977 }
 0x40f   :  { %v782_v51 = vadd.f32 %v780_v1, %v779_v62  ;;  %v784_v53 = vsub.f32 1.0, %v1978_v52  ;;  %v786_v56 = vmul.f32 %v1978_v52, %v2565_v60  ;;  %v2652_v60 = vld [vmem:[#allocation6 + $0x150] sm:$0xff]  ;;  %v2803_v1 = vld [vmem:[#allocation6 + $0xb8] sm:$0xff]  ;;  %v2813_v62 = vld [vmem:[#allocation6 + $0xa0] sm:$0xff] }
 0x410   :  { %v2820_v52 = vld [vmem:[#allocation6 + $0x78] sm:$0xff] }
 0x411   :  { %1979 = vtanh.f32 %v782_v51  ;;  %v2816_v51 = vld [vmem:[#allocation6 + $0x80] sm:$0xff] }
 0x41e   :  { %v1980_v44 = vpop.eup %1979 }
 0x41f   :  { %v785_v55 = vmul.f32 %v1980_v44, %v784_v53  ;;  %v2823_v53 = vld [vmem:[#allocation6 + $0x88] sm:$0xff] }
 0x420   :  { %v2826_v44 = vld [vmem:[#allocation6 + $0x68] sm:$0xff] }
 0x421   :  { %v2639_v58 = vadd.f32 %v786_v56, %v785_v55  ;;  %v2830_v55 = vld [vmem:[#allocation6 + $0x60] sm:$0xff]  ;;  %v2833_v56 = vld [vmem:[#allocation6 + $0x70] sm:$0xff] }
 0x423   :  { %789 = vst [vmem:[#allocation8 + $0x6] sm:$0x3] %v2639_v58  ;;  %857 = vmatmul.mubr.f32.vlgmr.msra.gmra.mxu0 %v2639_v58  ;;  %1823 = vmatmul.mubr.f32.vlgmr.msra.gmra.mxu1 %v2639_v58 }
 0x424   :  { %965 = vmatpush1.msra.mxu0 %v2644_v59  ;;  %1826 = vmatpush3.msra.mxu1 %v2214_v14  ;;  %v2664_v14 = vld [vmem:[#allocation6 + $0x128] sm:$0xff] }
 0x425   :  { %966 = vmatprep.subr.mxu0 %v2648_v7  ;;  %1827 = vmatprep.subr.mxu1 %v2989_v0 }
 0x426   :  { %967 = vmatpush1.msra.mxu0 %v2652_v60  ;;  %1828 = vmatpush3.msra.mxu1 %v2220_v16  ;;  %v2672_v16 = vld [vmem:[#allocation6 + $0x110] sm:$0xff] }
 0x427   :  { %968 = vmatprep.subr.mxu0 %v2656_v8  ;;  %1829 = vmatprep.subr.mxu1 %v2989_v0 }
 0x428   :  { %969 = vmatpush1.msra.mxu0 %v2660_v9  ;;  %1830 = vmatpush3.msra.mxu1 %v2226_v18  ;;  %v2680_v18 = vld [vmem:[#allocation6 + $0xf8] sm:$0xff] }
 0x429   :  { %970 = vmatprep.subr.mxu0 %v2664_v14  ;;  %1831 = vmatprep.subr.mxu1 %v2989_v0 }
 0x42a   :  { %971 = vmatpush1.msra.mxu0 %v2668_v10  ;;  %1832 = vmatpush3.msra.mxu1 %v2236_v21  ;;  %v2688_v21 = vld [vmem:[#allocation6 + $0xe0] sm:$0xff] }
 0x42b   :  { %972 = vmatprep.subr.mxu0 %v2672_v16  ;;  %1833 = vmatprep.subr.mxu1 %v2989_v0 }
 0x42c   :  { %973 = vmatpush1.msra.mxu0 %v2676_v11  ;;  %1834 = vmatpush3.msra.mxu1 %v2246_v24 }
 0x42d   :  { %974 = vmatprep.subr.mxu0 %v2680_v18  ;;  %1835 = vmatprep.subr.mxu1 %v2989_v0 }
 0x42e   :  { %975 = vmatpush1.msra.mxu0 %v2684_v12  ;;  %1836 = vmatpush3.msra.mxu1 %v2256_v27 }
 0x42f   :  { %976 = vmatprep.subr.mxu0 %v2688_v21  ;;  %1837 = vmatprep.subr.mxu1 %v2989_v0 }
 0x430   :  { %977 = vmatpush1.msra.mxu0 %v2692_v13  ;;  %1838 = vmatpush3.msra.mxu1 %v2266_v30 }
 0x431   :  { %978 = vmatprep.subr.mxu0 %v2223_v17  ;;  %1839 = vmatprep.subr.mxu1 %v2989_v0  ;;  %v2735_v17 = vld [vmem:[#allocation6 + $0x170] sm:$0xff] }
 0x432   :  { %979 = vmatpush1.msra.mxu0 %v2229_v19  ;;  %1840 = vmatpush3.msra.mxu1 %v2276_v33  ;;  %v791_v19 = vld [vmem:[#allocation3 + $0x18] sm:$0x3f] }
 0x433   :  { %980 = vmatprep.subr.mxu0 %v2233_v20  ;;  %1841 = vmatprep.subr.mxu1 %v2989_v0 }
 0x434   :  { %981 = vmatpush1.msra.mxu0 %v2239_v22  ;;  %1842 = vmatpush3.msra.mxu1 %v2286_v36 }
 0x435   :  { %982 = vmatprep.subr.mxu0 %v2243_v23  ;;  %1843 = vmatprep.subr.mxu1 %v2989_v0 }
 0x436   :  { %983 = vmatpush1.msra.mxu0 %v2249_v25  ;;  %1844 = vmatpush3.msra.mxu1 %v2296_v39 }
 0x437   :  { %984 = vmatprep.subr.mxu0 %v2253_v26  ;;  %1845 = vmatprep.subr.mxu1 %v2989_v0  ;;  %v941_v26 = vrot.slane %v791_v19, 2 }
 0x438   :  { %985 = vmatpush1.msra.mxu0 %v2259_v28  ;;  %1846 = vmatpush3.msra.mxu1 %v2306_v42 }
 0x439   :  { %986 = vmatprep.subr.mxu0 %v2263_v29  ;;  %1847 = vmatprep.subr.mxu1 %v2989_v0 }
 0x43a   :  { %987 = vmatpush1.msra.mxu0 %v2269_v31  ;;  %1848 = vmatpush3.msra.mxu1 %v2316_v45 }
 0x43b   :  { %988 = vmatprep.subr.mxu0 %v2273_v32  ;;  %1849 = vmatprep.subr.mxu1 %v2989_v0 }
 0x43c   :  { %989 = vmatpush1.msra.mxu0 %v2279_v34  ;;  %1850 = vmatpush3.msra.mxu1 %v2322_v46  ;;  %v952_v34 = vrot.slane %v791_v19, 4 }
 0x43d   :  { %990 = vmatprep.subr.mxu0 %v2283_v35  ;;  %1851 = vmatprep.subr.mxu1 %v2989_v0 }
 0x43e   :  { %991 = vmatpush1.msra.mxu0 %v2289_v37  ;;  %1852 = vmatpush3.msra.mxu1 %v2327_v47 }
 0x43f   :  { %992 = vmatprep.subr.mxu0 %v2293_v38  ;;  %1853 = vmatprep.subr.mxu1 %v2989_v0 }
 0x440   :  { %993 = vmatpush1.msra.mxu0 %v2997_v2  ;;  %1854 = vmatpush3.msra.mxu1 %v2998_v3  ;;  %v2747_v3 = vld [vmem:[#allocation6 + $0x178] sm:$0xff] }
 0x441   :  { %994 = vmatprep.subr.mxu0 %v2999_v4  ;;  %1855 = vmatprep.subr.mxu1 %v2989_v0  ;;  %v2753_v4 = vld [vmem:[#allocation6 + $0x160] sm:$0xff] }
 0x442   :  { %995 = vmatpush1.msra.mxu0 %v3000_v5  ;;  %1028 = vmatprep.mubr.f32.mxu0 %v2989_v0  ;;  %v2759_v5 = vld [vmem:[#allocation6 + $0x148] sm:$0xff] }
 0x443   :  { %1856 = vmatpush3.msra.mxu1 %v3001_v6  ;;  %1857 = vmatprep.mubr.msk.f32.mxu1 %vm2143_vm0, %v2989_v0  ;;  %v2765_v6 = vld [vmem:[#allocation6 + $0x130] sm:$0xff] }
 0x444   :  { %1136 = vmatprep.subr.mxu0 %v2735_v17  ;;  %1860 = vmatprep.subr.mxu1 %v2989_v0 }
 0x4e3   :  { %v858_v20 = vpop.f32.mrf.mxu0  ;;  %v929_v22 = vpop.f32.mrf.mxu1 }
 0x4e4   :  { %v933_v23 = vadd.f32 %v858_v20, %v791_v19  ;;  %v950_v35 = vadd.f32 %v2413_v63, %v929_v22  ;;  %v2840_v19 = vld [vmem:[#allocation6 + $0x48] sm:$0xff]  ;;  %v2843_v20 = vld [vmem:[#allocation6 + $0x58] sm:$0xff] }
 0x4e5   :  { %v1824_v24 = vpop.f32.mrf.mxu1  ;;  %v860_v27 = vpop.f32.mrf.mxu0  ;;  %v2846_v22 = vld [vmem:[#allocation6 + $0x38] sm:$0xff] }
 0x4e6   :  { %v1506_v25 = vmul.f32 -1.442695, %v933_v23  ;;  %v943_v28 = vadd.f32 %v941_v26, %v860_v27  ;;  %v2850_v23 = vld [vmem:[#allocation6 + $0x30] sm:$0xff]  ;;  %v2853_v24 = vld [vmem:[#allocation6 + $0x40] sm:$0xff]  ;;  %v2860_v26 = vld [vmem:[#allocation6 + $0x18] sm:$0xff] }
 0x4e7   :  { %3003 = vst [vmem:[#allocation13_spill] sm:$0xff] %v2860_v26  ;;  %v2863_v27 = vld [vmem:[#allocation6 + $0x28] sm:$0xff] }
 0x4e8   :  { %1981 = vpow2.f32 %v1506_v25  ;;  %v1507_v29 = vmul.f32 -1.442695, %v943_v28  ;;  %v2856_v25 = vld [vmem:[#allocation6 + $0x20] sm:$0xff]  ;;  %3004 = vst [vmem:[#allocation16_spill] sm:$0xff] %v2863_v27  ;;  %v2866_v28 = vld [vmem:[#allocation6 + $0x8] sm:$0xff] }
 0x4e9   :  { %3005 = vst [vmem:[#allocation14_spill] sm:$0xff] %v2866_v28 }
 0x4ea   :  { %1983 = vpow2.f32 %v1507_v29  ;;  %v2870_v29 = vld [vmem:[#allocation6] sm:$0xff] }
 0x4eb   :  { %3006 = vst [vmem:[#allocation15_spill] sm:$0xff] %v2870_v29 }
 0x4f5   :  { %v1982_v30 = vpop.eup %1981 }
 0x4f6   :  { %v937_v31 = vadd.f32 1.0, %v1982_v30  ;;  %v2874_v30 = vld [vmem:[#allocation6 + $0x10] sm:$0xff] }
 0x4f7   :  { %v1984_v32 = vpop.eup %1983  ;;  %3007 = vst [vmem:[#allocation17_spill] sm:$0xff] %v2874_v30 }
 0x4f8   :  { %1985 = vrcp.f32 %v937_v31  ;;  %v947_v33 = vadd.f32 1.0, %v1984_v32  ;;  %v963_v31 = vld [vmem:[#allocation3 + $0x1e] sm:$0x3f] }
 0x4fa   :  { %1987 = vrcp.f32 %v947_v33 }
 0x505   :  { %v1986_v36 = vpop.eup %1985 }
 0x506   :  { %v951_v37 = vmul.f32 %v1986_v36, %v950_v35 }
 0x507   :  { %v1988_v39 = vpop.eup %1987 }
 0x508   :  { %v954_v38 = vadd.f32 %v952_v34, %v951_v37  ;;  %v956_v42 = vsub.f32 1.0, %v1988_v39  ;;  %v958_v47 = vmul.f32 %v1988_v39, %v2639_v58  ;;  %v2836_v58 = vld [vmem:[#allocation6 + $0x50] sm:$0xff]  ;;  %v1113_v37 = vrot.slane %v963_v31, 2 }
 0x50a   :  { %1989 = vtanh.f32 %v954_v38 }
 0x517   :  { %v1990_v45 = vpop.eup %1989 }
 0x518   :  { %v957_v46 = vmul.f32 %v1990_v45, %v956_v42 }
 0x51a   :  { %v2741_v2 = vadd.f32 %v958_v47, %v957_v46 }
 0x51c   :  { %961 = vst [vmem:[#allocation8 + $0x8] sm:$0x3] %v2741_v2  ;;  %1029 = vmatmul.mubr.f32.vlgmr.msra.gmra.mxu0 %v2741_v2  ;;  %1858 = vmatmul.mubr.f32.vlgmr.msra.gmra.mxu1 %v2741_v2 }
 0x51d   :  { %1137 = vmatpush1.msra.mxu0 %v2644_v59  ;;  %1861 = vmatpush3.msra.mxu1 %v2747_v3 }
 0x51e   :  { %1138 = vmatprep.subr.mxu0 %v2648_v7  ;;  %1862 = vmatprep.subr.mxu1 %v2989_v0 }
 0x51f   :  { %1139 = vmatpush1.msra.mxu0 %v2652_v60  ;;  %1863 = vmatpush3.msra.mxu1 %v2753_v4 }
 0x520   :  { %1140 = vmatprep.subr.mxu0 %v2656_v8  ;;  %1864 = vmatprep.subr.mxu1 %v2989_v0 }
 0x521   :  { %1141 = vmatpush1.msra.mxu0 %v2660_v9  ;;  %1865 = vmatpush3.msra.mxu1 %v2759_v5 }
 0x522   :  { %1142 = vmatprep.subr.mxu0 %v2664_v14  ;;  %1866 = vmatprep.subr.mxu1 %v2989_v0 }
 0x523   :  { %1143 = vmatpush1.msra.mxu0 %v2668_v10  ;;  %1867 = vmatpush3.msra.mxu1 %v2765_v6 }
 0x524   :  { %1144 = vmatprep.subr.mxu0 %v2672_v16  ;;  %1868 = vmatprep.subr.mxu1 %v2989_v0 }
 0x525   :  { %1145 = vmatpush1.msra.mxu0 %v2676_v11  ;;  %1869 = vmatpush3.msra.mxu1 %v2771_v15 }
 0x526   :  { %1146 = vmatprep.subr.mxu0 %v2680_v18  ;;  %1870 = vmatprep.subr.mxu1 %v2989_v0 }
 0x527   :  { %1147 = vmatpush1.msra.mxu0 %v2684_v12  ;;  %1871 = vmatpush3.msra.mxu1 %v2777_v54 }
 0x528   :  { %1148 = vmatprep.subr.mxu0 %v2688_v21  ;;  %1872 = vmatprep.subr.mxu1 %v2989_v0 }
 0x529   :  { %1149 = vmatpush1.msra.mxu0 %v2692_v13  ;;  %1873 = vmatpush3.msra.mxu1 %v2783_v40 }
 0x52a   :  { %1150 = vmatprep.subr.mxu0 %v2786_v41  ;;  %1874 = vmatprep.subr.mxu1 %v2989_v0 }
 0x52b   :  { %1151 = vmatpush1.msra.mxu0 %v2790_v43  ;;  %1875 = vmatpush3.msra.mxu1 %v2793_v48 }
 0x52c   :  { %1152 = vmatprep.subr.mxu0 %v2796_v49  ;;  %1876 = vmatprep.subr.mxu1 %v2989_v0 }
 0x52d   :  { %1153 = vmatpush1.msra.mxu0 %v2800_v61  ;;  %1877 = vmatpush3.msra.mxu1 %v2803_v1 }
 0x52e   :  { %1154 = vmatprep.subr.mxu0 %v2806_v57  ;;  %1878 = vmatprep.subr.mxu1 %v2989_v0 }
 0x52f   :  { %1155 = vmatpush1.msra.mxu0 %v2810_v50  ;;  %1879 = vmatpush3.msra.mxu1 %v2813_v62 }
 0x530   :  { %1156 = vmatprep.subr.mxu0 %v2816_v51  ;;  %1880 = vmatprep.subr.mxu1 %v2989_v0 }
 0x531   :  { %1157 = vmatpush1.msra.mxu0 %v2820_v52  ;;  %1881 = vmatpush3.msra.mxu1 %v2823_v53 }
 0x532   :  { %1158 = vmatprep.subr.mxu0 %v2826_v44  ;;  %1882 = vmatprep.subr.mxu1 %v2989_v0 }
 0x533   :  { %1159 = vmatpush1.msra.mxu0 %v2830_v55  ;;  %1883 = vmatpush3.msra.mxu1 %v2833_v56 }
 0x534   :  { %1160 = vmatprep.subr.mxu0 %v2836_v58  ;;  %1884 = vmatprep.subr.mxu1 %v2989_v0 }
 0x535   :  { %1161 = vmatpush1.msra.mxu0 %v2840_v19  ;;  %1885 = vmatpush3.msra.mxu1 %v2843_v20 }
 0x536   :  { %1162 = vmatprep.subr.mxu0 %v2846_v22  ;;  %1886 = vmatprep.subr.mxu1 %v2989_v0 }
 0x537   :  { %1163 = vmatpush1.msra.mxu0 %v2850_v23  ;;  %1887 = vmatpush3.msra.mxu1 %v2853_v24 }
 0x538   :  { %1164 = vmatprep.subr.mxu0 %v2856_v25  ;;  %1888 = vmatprep.subr.mxu1 %v2989_v0 }
 0x539   :  { %1165 = vmatpush1.msra.mxu0 %v2860_v26  ;;  %1889 = vmatpush3.msra.mxu1 %v2863_v27 }
 0x53a   :  { %1166 = vmatprep.subr.mxu0 %v2866_v28  ;;  %1890 = vmatprep.subr.mxu1 %v2989_v0 }
 0x53b   :  { %1167 = vmatpush1.msra.mxu0 %v2870_v29  ;;  %1200 = vmatprep.mubr.f32.mxu0 %v2989_v0 }
 0x53c   :  { %1891 = vmatpush3.msra.mxu1 %v2874_v30  ;;  %1892 = vmatprep.mubr.msk.f32.mxu1 %vm2143_vm0, %v2989_v0 }
 0x53d   :  { %1308 = vmatprep.subr.mxu0 %v2735_v17  ;;  %1895 = vmatprep.subr.mxu1 %v2989_v0  ;;  %v1124_v17 = vrot.slane %v963_v31, 4 }
 0x5dc   :  { %v1030_v32 = vpop.f32.mrf.mxu0  ;;  %v1101_v33 = vpop.f32.mrf.mxu1 }
 0x5dd   :  { %v1105_v34 = vadd.f32 %v1030_v32, %v963_v31  ;;  %v1122_v29 = vadd.f32 %v2413_v63, %v1101_v33  ;;  %v3008_v63 = vld [vmem:[#allocation13_spill] sm:$0xff] }
 0x5de   :  { %v1859_v35 = vpop.f32.mrf.mxu1  ;;  %v1032_v38 = vpop.f32.mrf.mxu0 }
 0x5df   :  { %v1508_v36 = vmul.f32 -1.442695, %v1105_v34  ;;  %v1115_v39 = vadd.f32 %v1113_v37, %v1032_v38 }
 0x5e1   :  { %1991 = vpow2.f32 %v1508_v36  ;;  %v1509_v42 = vmul.f32 -1.442695, %v1115_v39 }
 0x5e3   :  { %1993 = vpow2.f32 %v1509_v42 }
 0x5ee   :  { %v1992_v45 = vpop.eup %1991 }
 0x5ef   :  { %v1109_v46 = vadd.f32 1.0, %v1992_v45 }
 0x5f0   :  { %v1994_v47 = vpop.eup %1993 }
 0x5f1   :  { %1995 = vrcp.f32 %v1109_v46  ;;  %v1119_v30 = vadd.f32 1.0, %v1994_v47 }
 0x5f3   :  { %1997 = vrcp.f32 %v1119_v30 }
 0x5fe   :  { %v1996_v28 = vpop.eup %1995 }
 0x5ff   :  { %v1123_v27 = vmul.f32 %v1996_v28, %v1122_v29 }
 0x600   :  { %v1998_v34 = vpop.eup %1997 }
 0x601   :  { %v1126_v32 = vadd.f32 %v1124_v17, %v1123_v27  ;;  %v1128_v35 = vsub.f32 1.0, %v1998_v34  ;;  %v1130_v37 = vmul.f32 %v1998_v34, %v2741_v2 }
 0x603   :  { %1999 = vtanh.f32 %v1126_v32 }
 0x610   :  { %v2000_v26 = vpop.eup %1999 }
 0x611   :  { %v1129_v36 = vmul.f32 %v2000_v26, %v1128_v35 }
 0x613   :  { %v2883_v38 = vadd.f32 %v1130_v37, %v1129_v36 }
 0x615   :  { %1133 = vst [vmem:[#allocation8 + $0xa] sm:$0x3] %v2883_v38  ;;  %1201 = vmatmul.mubr.f32.vlgmr.msra.gmra.mxu0 %v2883_v38  ;;  %1893 = vmatmul.mubr.f32.vlgmr.msra.gmra.mxu1 %v2883_v38 }
 0x616   :  { %1309 = vmatpush1.msra.mxu0 %v2644_v59  ;;  %1896 = vmatpush3.msra.mxu1 %v2747_v3  ;;  %v3009_v59 = vld [vmem:[#allocation16_spill] sm:$0xff] }
 0x617   :  { %1310 = vmatprep.subr.mxu0 %v2648_v7  ;;  %1897 = vmatprep.subr.mxu1 %v2989_v0  ;;  %v3010_v7 = vld [vmem:[#allocation14_spill] sm:$0xff] }
 0x618   :  { %1311 = vmatpush1.msra.mxu0 %v2652_v60  ;;  %1898 = vmatpush3.msra.mxu1 %v2753_v4  ;;  %v3011_v60 = vld [vmem:[#allocation15_spill] sm:$0xff] }
 0x619   :  { %1312 = vmatprep.subr.mxu0 %v2656_v8  ;;  %1899 = vmatprep.subr.mxu1 %v2989_v0  ;;  %v3012_v8 = vld [vmem:[#allocation17_spill] sm:$0xff] }
 0x61a   :  { %1313 = vmatpush1.msra.mxu0 %v2660_v9  ;;  %1900 = vmatpush3.msra.mxu1 %v2759_v5  ;;  %v1135_v9 = vld [vmem:[#allocation3 + $0x24] sm:$0x3f] }
 0x61b   :  { %1314 = vmatprep.subr.mxu0 %v2664_v14  ;;  %1901 = vmatprep.subr.mxu1 %v2989_v0 }
 0x61c   :  { %1315 = vmatpush1.msra.mxu0 %v2668_v10  ;;  %1902 = vmatpush3.msra.mxu1 %v2765_v6 }
 0x61d   :  { %1316 = vmatprep.subr.mxu0 %v2672_v16  ;;  %1903 = vmatprep.subr.mxu1 %v2989_v0 }
 0x61e   :  { %1317 = vmatpush1.msra.mxu0 %v2676_v11  ;;  %1904 = vmatpush3.msra.mxu1 %v2771_v15  ;;  %v1296_v15 = vrot.slane %v1135_v9, 4 }
 0x61f   :  { %1318 = vmatprep.subr.mxu0 %v2680_v18  ;;  %1905 = vmatprep.subr.mxu1 %v2989_v0 }
 0x620   :  { %1319 = vmatpush1.msra.mxu0 %v2684_v12  ;;  %1906 = vmatpush3.msra.mxu1 %v2777_v54  ;;  %v1285_v12 = vrot.slane %v1135_v9, 2 }
 0x621   :  { %1320 = vmatprep.subr.mxu0 %v2688_v21  ;;  %1907 = vmatprep.subr.mxu1 %v2989_v0 }
 0x622   :  { %1321 = vmatpush1.msra.mxu0 %v2692_v13  ;;  %1908 = vmatpush3.msra.mxu1 %v2783_v40 }
 0x623   :  { %1322 = vmatprep.subr.mxu0 %v2786_v41  ;;  %1909 = vmatprep.subr.mxu1 %v2989_v0 }
 0x624   :  { %1323 = vmatpush1.msra.mxu0 %v2790_v43  ;;  %1910 = vmatpush3.msra.mxu1 %v2793_v48 }
 0x625   :  { %1324 = vmatprep.subr.mxu0 %v2796_v49  ;;  %1911 = vmatprep.subr.mxu1 %v2989_v0 }
 0x626   :  { %1325 = vmatpush1.msra.mxu0 %v2800_v61  ;;  %1912 = vmatpush3.msra.mxu1 %v2803_v1 }
 0x627   :  { %1326 = vmatprep.subr.mxu0 %v2806_v57  ;;  %1913 = vmatprep.subr.mxu1 %v2989_v0 }
 0x628   :  { %1327 = vmatpush1.msra.mxu0 %v2810_v50  ;;  %1914 = vmatpush3.msra.mxu1 %v2813_v62  ;;  %v1307_v62 = vld [vmem:[#allocation3 + $0x2a] sm:$0x3f] }
 0x629   :  { %1328 = vmatprep.subr.mxu0 %v2816_v51  ;;  %1915 = vmatprep.subr.mxu1 %v2989_v0  ;;  %v1468_v26 = vrot.slane %v1307_v62, 4 }
 0x62a   :  { %1329 = vmatpush1.msra.mxu0 %v2820_v52  ;;  %1916 = vmatpush3.msra.mxu1 %v2823_v53 }
 0x62b   :  { %1330 = vmatprep.subr.mxu0 %v2826_v44  ;;  %1917 = vmatprep.subr.mxu1 %v2989_v0 }
 0x62c   :  { %1331 = vmatpush1.msra.mxu0 %v2830_v55  ;;  %1918 = vmatpush3.msra.mxu1 %v2833_v56  ;;  %v1457_v56 = vrot.slane %v1307_v62, 2 }
 0x62d   :  { %1332 = vmatprep.subr.mxu0 %v2836_v58  ;;  %1919 = vmatprep.subr.mxu1 %v2989_v0 }
 0x62e   :  { %1333 = vmatpush1.msra.mxu0 %v2840_v19  ;;  %1920 = vmatpush3.msra.mxu1 %v2843_v20 }
 0x62f   :  { %1334 = vmatprep.subr.mxu0 %v2846_v22  ;;  %1921 = vmatprep.subr.mxu1 %v2989_v0 }
 0x630   :  { %1335 = vmatpush1.msra.mxu0 %v2850_v23  ;;  %1922 = vmatpush3.msra.mxu1 %v2853_v24 }
 0x631   :  { %1336 = vmatprep.subr.mxu0 %v2856_v25  ;;  %1923 = vmatprep.subr.mxu1 %v2989_v0 }
 0x632   :  { %1337 = vmatpush1.msra.mxu0 %v3008_v63  ;;  %1924 = vmatpush3.msra.mxu1 %v3009_v59 }
 0x633   :  { %1338 = vmatprep.subr.mxu0 %v3010_v7  ;;  %1925 = vmatprep.subr.mxu1 %v2989_v0 }
 0x634   :  { %1339 = vmatpush1.msra.mxu0 %v3011_v60  ;;  %1372 = vmatprep.mubr.f32.mxu0 %v2989_v0 }
 0x635   :  { %1926 = vmatpush3.msra.mxu1 %v3012_v8  ;;  %1927 = vmatprep.mubr.msk.f32.mxu1 %vm2143_vm0, %v2989_v0  ;;  %v2069_v0 = vld [vmem:[%s2962_s2] ss:$0 sm:$0xff]  ;;  %s2144_s2 = smov [#allocation8]  }
 0x636   :  { %s1484_s28 = sshll.u32 %s2144_s2, 4  ;;  %s1485_s28 = int_to_ptr.vmem [resolvable:$true] %s1484_s28 }
 0x637   :  { %s2110_s29 = scalar_lea.vmem %s1485_s28, 256  ;;  %p2115_p11 = scmp.lt.s32.totalorder %s1485_s28, %s1485_s28 }
 0x638   :  { %p2111_p10 = scmp.ne.s32.totalorder %s1485_s28, %s2110_s29  ;;  %p2116_p12 = scmp.lt.s32.totalorder %s2110_s29, %s2110_s29 }
 0x63a   :  { %p2117_p13 = por %p2116_p12, %p2115_p11 }
 0x63c   :  { %p2118_p0 = pnand %p2117_p13, %p2111_p10 }
 0x6d5   :  { %v1202_v14 = vpop.f32.mrf.mxu0  ;;  %v1273_v10 = vpop.f32.mrf.mxu1 }
 0x6d6   :  { %v1277_v16 = vadd.f32 %v1202_v14, %v1135_v9  ;;  %v1294_v54 = vadd.f32 %v2069_v0, %v1273_v10 }
 0x6d7   :  { %v1894_v11 = vpop.f32.mrf.mxu1  ;;  %v1204_v21 = vpop.f32.mrf.mxu0 }
 0x6d8   :  { %v1510_v18 = vmul.f32 -1.442695, %v1277_v16  ;;  %v1287_v13 = vadd.f32 %v1285_v12, %v1204_v21 }
 0x6da   :  { %2001 = vpow2.f32 %v1510_v18  ;;  %v1511_v2 = vmul.f32 -1.442695, %v1287_v13 }
 0x6dc   :  { %2003 = vpow2.f32 %v1511_v2 }
 0x6e7   :  { %v2002_v3 = vpop.eup %2001 }
 0x6e8   :  { %v1281_v4 = vadd.f32 1.0, %v2002_v3 }
 0x6e9   :  { %v2004_v5 = vpop.eup %2003 }
 0x6ea   :  { %2005 = vrcp.f32 %v1281_v4  ;;  %v1291_v6 = vadd.f32 1.0, %v2004_v5 }
 0x6ec   :  { %2007 = vrcp.f32 %v1291_v6 }
 0x6f7   :  { %v2006_v40 = vpop.eup %2005 }
 0x6f8   :  { %v1295_v41 = vmul.f32 %v2006_v40, %v1294_v54 }
 0x6f9   :  { %v2008_v48 = vpop.eup %2007 }
 0x6fa   :  { %v1298_v43 = vadd.f32 %v1296_v15, %v1295_v41  ;;  %v1300_v49 = vsub.f32 1.0, %v2008_v48  ;;  %v1302_v57 = vmul.f32 %v2008_v48, %v2883_v38 }
 0x6fc   :  { %2009 = vtanh.f32 %v1298_v43 }
 0x709   :  { %v2010_v61 = vpop.eup %2009 }
 0x70a   :  { %v1301_v1 = vmul.f32 %v2010_v61, %v1300_v49 }
 0x70c   :  { %v1303_v50 = vadd.f32 %v1302_v57, %v1301_v1 }
 0x70e   :  { %1305 = vst [vmem:[#allocation8 + $0xc] sm:$0x3] %v1303_v50  ;;  %1373 = vmatmul.mubr.f32.vlgmr.msra.gmra.mxu0 %v1303_v50  ;;  %1928 = vmatmul.mubr.f32.vlgmr.msra.gmra.mxu1 %v1303_v50 }
 0x7ce   :  { %v1374_v51 = vpop.f32.mrf.mxu0  ;;  %v1445_v52 = vpop.f32.mrf.mxu1 }
 0x7cf   :  { %v1449_v53 = vadd.f32 %v1374_v51, %v1307_v62  ;;  %v1466_v27 = vadd.f32 %v2069_v0, %v1445_v52 }
 0x7d0   :  { %v1929_v44 = vpop.f32.mrf.mxu1  ;;  %v1376_v58 = vpop.f32.mrf.mxu0 }
 0x7d1   :  { %v1512_v55 = vmul.f32 -1.442695, %v1449_v53  ;;  %v1459_v19 = vadd.f32 %v1457_v56, %v1376_v58 }
 0x7d3   :  { %2011 = vpow2.f32 %v1512_v55  ;;  %v1513_v20 = vmul.f32 -1.442695, %v1459_v19 }
 0x7d5   :  { %2013 = vpow2.f32 %v1513_v20 }
 0x7e0   :  { %v2012_v22 = vpop.eup %2011 }
 0x7e1   :  { %v1453_v23 = vadd.f32 1.0, %v2012_v22 }
 0x7e2   :  { %v2014_v24 = vpop.eup %2013 }
 0x7e3   :  { %2015 = vrcp.f32 %v1453_v23  ;;  %v1463_v25 = vadd.f32 1.0, %v2014_v24 }
 0x7e5   :  { %2017 = vrcp.f32 %v1463_v25 }
 0x7f0   :  { %v2016_v28 = vpop.eup %2015 }
 0x7f1   :  { %v1467_v29 = vmul.f32 %v2016_v28, %v1466_v27 }
 0x7f2   :  { %v2018_v31 = vpop.eup %2017 }
 0x7f3   :  { %v1470_v30 = vadd.f32 %v1468_v26, %v1467_v29  ;;  %v1472_v33 = vsub.f32 1.0, %v2018_v31  ;;  %v1474_v45 = vmul.f32 %v2018_v31, %v1303_v50 }
 0x7f5   :  { %2019 = vtanh.f32 %v1470_v30 }
 0x802   :  { %v2020_v39 = vpop.eup %2019 }
 0x803   :  { %v1473_v42 = vmul.f32 %v2020_v39, %v1472_v33 }
 0x805   :  { %v1475_v46 = vadd.f32 %v1474_v45, %v1473_v42 }
 0x807   :  { %1477 = vst [vmem:[#allocation8 + $0xe] sm:$0x3] %v1475_v46  ;;  %1478 = vst [vmem:[#allocation2] sm:$0x3] %v1475_v46 }
 0x808   :  { %2121 = shalt.err (!%p2118_p0)
}
 0x809   :  { %s2145_s30 = smov 32   ;;  %s2146_s4 = smov 2  }
 0x80a   :  { %1490 = dma.vmem_to_hbm [thread:$0]  %s1485_s28, 256, %s2963_s3, [#allocation5], %s2145_s30, %s2145_s30, %s2146_s4  }
 0x80b   :  { %2134 = dma.done.wait [#allocation5], 256  }
 0x80c   :  { %2135 = vsyncadd [#allocation5], 4294967040 }
 0x80d   :  { %1494 = vsyncpa [#allocation4], 1 }
 0x80e   :  { %1495 = vsyncpa [#allocation7], 1 }
 0x80f   :  { %1496 = vsyncpa [#allocation5], 1 }

</bundles_post_ra>
